<compile_context>
chip_gen: v7x
topology: tpu7x:2x2x1
jax: 0.10.0
libtpu: 0.0.40
codegen_flags: <defaults>
</compile_context>

<pallas_src>
import functools
import math

import jax
import jax.numpy as jnp
from jax.experimental import pallas as pl
from jax.experimental.pallas import tpu as pltpu


# ---------------------------------------------------------------------------
# Small helpers
# ---------------------------------------------------------------------------
def _largest_divisor(dim, cap, align):
    """Largest t <= cap with dim % t == 0 and t % align == 0; falls back to dim."""
    for t in range(min(dim, cap), 0, -1):
        if dim % t == 0 and t % align == 0:
            return t
    return dim


def _vmem_physical_bytes():
    try:
        return int(pltpu.get_tpu_info().vmem_capacity_bytes)
    except Exception:
        return 64 << 20            # assume the smallest per-core VMEM (v7x)


def _vmem_budget_bytes():
    # leave ~1/3 of physical VMEM for compiler-internal scratch / pipeline buffers
    return (_vmem_physical_bytes() * 2) // 3


def _vmem_limit_bytes(tile_bytes):
    """Scoped-VMEM limit from the actual per-step footprint plus headroom."""
    return max(min(int(tile_bytes) + (8 << 20), _vmem_budget_bytes()), 16 << 20)


def _guard_fits(name, tile_bytes):
    cap = _vmem_budget_bytes()
    if tile_bytes > cap:
        raise ValueError(
            f"{name}: per-step VMEM footprint {tile_bytes / 2**20:.1f} MiB exceeds "
            f"the {cap / 2**20:.1f} MiB budget (a non-divisible dimension fell back "
            f"to a full-size block); use divisible shapes or smaller tiles.")


def _exp_dtype():
    """bf16 softmax exponentials on v6e/v7x (EUP-bound at small head_dim);
    f32 on earlier generations whose EUP has no native bf16."""
    try:
        kind = jax.devices()[0].device_kind.lower()
    except Exception:
        return jnp.float32
    if any(old in kind for old in ("v2", "v3", "v4", "v5")):
        return jnp.float32
    return jnp.bfloat16


# ---------------------------------------------------------------------------
# Kernel 1: tiled linear projection  y = x @ W + b   (W pre-transposed to [Cin, Cout])
# ---------------------------------------------------------------------------
def _linear_kernel(x_ref, w_ref, b_ref, o_ref, acc_ref):
    @pl.when(pl.program_id(2) == 0)
    def _init():
        acc_ref[...] = jnp.zeros_like(acc_ref)

    # Cast the activation tile to bf16 in VMEM (VPU has slack under the MXU);
    # avoids an XLA-level bf16 copy of x in HBM.
    acc_ref[...] += jnp.dot(x_ref[...].astype(jnp.bfloat16), w_ref[...],
                            preferred_element_type=jnp.float32)

    @pl.when(pl.program_id(2) == pl.num_programs(2) - 1)
    def _store():
        o_ref[...] = (acc_ref[...] + b_ref[...]).astype(o_ref.dtype)


def linear(x2d, w, b, *, out_dtype, tm=512, tn=512, tk=512):
    """x2d: [M, K] (f32 or bf16), w: [K, N] bf16, b: [1, N] f32 -> [M, N] out_dtype."""
    M, K = x2d.shape
    Kw, N = w.shape
    assert K == Kw and b.shape == (1, N)
    tm = _largest_divisor(M, tm, 16)     # 16-row sublane alignment (bf16 packing)
    tn = _largest_divisor(N, tn, 128)    # lane dim: 128-aligned
    tk = _largest_divisor(K, tk, 128)    # lane dim of x block: must stay 128-aligned
    grid = (M // tm, N // tn, K // tk)

    out_itemsize = jnp.dtype(out_dtype).itemsize
    tile_bytes = (2 * tm * tk * x2d.dtype.itemsize       # x tiles (double-buffered)
                  + 2 * tk * tn * w.dtype.itemsize       # w tiles
                  + 2 * tn * b.dtype.itemsize            # bias tiles
                  + 2 * tm * tn * out_itemsize           # out tiles
                  + tm * tn * 4)                         # f32 accumulator scratch
    _guard_fits("linear", tile_bytes)

    cost = pl.CostEstimate(
        flops=2 * M * N * K,
        transcendentals=0,
        bytes_accessed=(M * K * x2d.dtype.itemsize + K * N * w.dtype.itemsize
                        + N * b.dtype.itemsize + M * N * out_itemsize))

    return pl.pallas_call(
        _linear_kernel,
        out_shape=jax.ShapeDtypeStruct((M, N), out_dtype),
        grid_spec=pltpu.PrefetchScalarGridSpec(
            num_scalar_prefetch=0,
            grid=grid,
            in_specs=[
                pl.BlockSpec((tm, tk), lambda i, j, k: (i, k)),
                pl.BlockSpec((tk, tn), lambda i, j, k: (k, j)),
                pl.BlockSpec((1, tn), lambda i, j, k: (0, j)),
            ],
            out_specs=pl.BlockSpec((tm, tn), lambda i, j, k: (i, j)),
            scratch_shapes=[pltpu.VMEM((tm, tn), jnp.float32)],
        ),
        compiler_params=pltpu.CompilerParams(
            dimension_semantics=("parallel", "parallel", "arbitrary"),
            vmem_limit_bytes=_vmem_limit_bytes(tile_bytes),
        ),
        cost_estimate=cost,
    )(x2d, w, b)


# ---------------------------------------------------------------------------
# Kernel 2: multi-head attention with flash-style online softmax.
#   One grid step = (batch, query tile, KV tile); all heads handled inside.
# ---------------------------------------------------------------------------
def _attn_kernel(q_ref, k_ref, v_ref, o_ref, m_sc, l_sc, acc_sc, *,
                 num_heads, head_dim, group, exp_dtype):
    """q_ref: [tq, C] (softmax scale pre-folded into the QKV weights)
       k_ref, v_ref: [tk, C]
       o_ref: [tq, C] lane-dense, written on the last KV step."""
    H, D, G = num_heads, head_dim, group
    kv_i = pl.program_id(2)

    @pl.when(kv_i == 0)
    def _init():
        m_sc[...] = jnp.full_like(m_sc, -jnp.inf)
        l_sc[...] = jnp.zeros_like(l_sc)
        acc_sc[...] = jnp.zeros_like(acc_sc)

    # Heads are processed in groups whose combined width (G*D) is a multiple of
    # 128 lanes, so every accumulator / output store is a full, unmasked vst.
    for g0 in range(0, H, G):
        pv_parts, alpha_parts, m_parts, l_parts = [], [], [], []
        for h in range(g0, g0 + G):
            q = q_ref[:, h * D:(h + 1) * D]                    # [tq, D] bf16 (pre-scaled)
            k = k_ref[:, h * D:(h + 1) * D]                    # [tk, D] bf16
            v = v_ref[:, h * D:(h + 1) * D]                    # [tk, D] bf16
            # QK^T without an explicit transpose: contract the last dims.
            s = jax.lax.dot_general(q, k, (((1,), (1,)), ((), ())),
                                    preferred_element_type=jnp.float32)  # [tq, tk] f32
            m_prev = m_sc[:, h:h + 1]                                    # [tq, 1]
            m_new = jnp.maximum(m_prev, jnp.max(s, axis=-1, keepdims=True))
            alpha = jnp.exp(m_prev - m_new)                              # f32
            # bf16 exponentials on v6e/v7x (EUP-bound regime); f32 on v5e.
            p = jnp.exp((s - m_new).astype(exp_dtype))                   # [tq, tk]
            l_parts.append(alpha * l_sc[:, h:h + 1]
                           + jnp.sum(p, axis=-1, keepdims=True, dtype=jnp.float32))
            m_parts.append(m_new)
            pv = jnp.dot(p.astype(v.dtype), v,
                         preferred_element_type=jnp.float32)             # [tq, D] f32
            pv_parts.append(pv)
            alpha_parts.append(jnp.broadcast_to(alpha, pv.shape))
        lo, hi = g0 * D, (g0 + G) * D
        acc_sc[:, lo:hi] = (jnp.concatenate(alpha_parts, axis=-1) * acc_sc[:, lo:hi]
                            + jnp.concatenate(pv_parts, axis=-1))
        m_sc[:, g0:g0 + G] = jnp.concatenate(m_parts, axis=-1)
        l_sc[:, g0:g0 + G] = jnp.concatenate(l_parts, axis=-1)

    @pl.when(kv_i == pl.num_programs(2) - 1)
    def _finalize():
        for g0 in range(0, H, G):
            parts = []
            for h in range(g0, g0 + G):
                inv = pl.reciprocal(l_sc[:, h:h + 1], approx=True)   # EUP, ~1e-3 rel err
                parts.append(acc_sc[:, h * D:(h + 1) * D] * inv)
            o_ref[:, g0 * D:(g0 + G) * D] = (
                jnp.concatenate(parts, axis=-1).astype(o_ref.dtype))


def attention(qkv, *, num_heads, head_dim, q_block=512, kv_block=512):
    """qkv: [B, L, 3C] packed bf16 (scale folded into Q columns) -> [B, L, C] bf16."""
    B, L, C3 = qkv.shape
    C = num_heads * head_dim
    assert C3 == 3 * C
    tq = _largest_divisor(L, q_block, 16)
    tk = _largest_divisor(L, kv_block, 16)

    if C % 128 == 0:
        # Zero-copy split of the packed QKV via last-dim block indices 0/1/2:
        # each operand only DMAs the C columns it actually reads.
        q_arr, k_arr, v_arr = qkv, qkv, qkv
        qc, kc, vc = 0, 1, 2
    else:
        # TODO(synk): non-128-multiple C falls back to an XLA slice (one extra HBM
        # pass) because a C-wide last-dim block would violate the lane-tiling rule.
        q_arr = qkv[..., 0 * C:1 * C]
        k_arr = qkv[..., 1 * C:2 * C]
        v_arr = qkv[..., 2 * C:3 * C]
        qc = kc = vc = 0

    # Head group size so accumulator / output stores are full 128-lane stores.
    group = num_heads
    for cand in range(1, num_heads + 1):
        if num_heads % cand == 0 and (cand * head_dim) % 128 == 0:
            group = cand
            break

    tile_bytes = (2 * tq * C * 2            # Q tiles (bf16, double-buffered)
                  + 2 * tk * C * 2 * 2      # K and V tiles
                  + 2 * tq * C * 2          # output tiles
                  + tq * C * 4              # f32 accumulator scratch
                  + 2 * tq * num_heads * 4)  # m / l scratch
    _guard_fits("attention", tile_bytes)

    kernel = functools.partial(_attn_kernel, num_heads=num_heads,
                               head_dim=head_dim, group=group,
                               exp_dtype=_exp_dtype())
    cost = pl.CostEstimate(
        flops=4 * B * L * L * C,                  # QK^T + PV
        transcendentals=B * num_heads * L * L,    # softmax exp
        bytes_accessed=B * L * C * 2 * 4)         # q,k,v read + out write (bf16)

    return pl.pallas_call(
        kernel,
        out_shape=jax.ShapeDtypeStruct((B, L, C), jnp.bfloat16),
        grid_spec=pltpu.PrefetchScalarGridSpec(
            num_scalar_prefetch=0,
            grid=(B, L // tq, L // tk),
            in_specs=[
                # Q block: constant along the KV axis -> DMA'd once per (b, q-tile).
                pl.BlockSpec((None, tq, C), lambda b, qi, kv, c=qc: (b, qi, c)),
                # K / V tiles streamed along the KV ("arbitrary") axis.
                pl.BlockSpec((None, tk, C), lambda b, qi, kv, c=kc: (b, kv, c)),
                pl.BlockSpec((None, tk, C), lambda b, qi, kv, c=vc: (b, kv, c)),
            ],
            out_specs=pl.BlockSpec((None, tq, C), lambda b, qi, kv: (b, qi, 0)),
            scratch_shapes=[
                pltpu.VMEM((tq, num_heads), jnp.float32),   # running max  m
                pltpu.VMEM((tq, num_heads), jnp.float32),   # running sum  l
                pltpu.VMEM((tq, C), jnp.float32),           # output accumulator
            ],
        ),
        compiler_params=pltpu.CompilerParams(
            dimension_semantics=("parallel", "parallel", "arbitrary"),
            vmem_limit_bytes=_vmem_limit_bytes(tile_bytes),
        ),
        cost_estimate=cost,
    )(q_arr, k_arr, v_arr)


# ---------------------------------------------------------------------------
# One-time weight packing (weight-load time, not per forward)
# ---------------------------------------------------------------------------
def pack_self_attention_params(params, num_heads):
    """Fused bf16 [C, 3C] QKV weight with the softmax scale folded into the Q
    columns, fused f32 bias, and bf16 output-projection weight."""
    C = params["wq"].shape[0]
    D = C // num_heads
    scale = 1.0 / math.sqrt(D)
    w_qkv = jnp.concatenate([params["wq"] * scale, params["wk"], params["wv"]],
                            axis=1).astype(jnp.bfloat16)
    b_qkv = jnp.concatenate([params["bq"] * scale, params["bk"], params["bv"]],
                            axis=1).astype(jnp.float32)
    return {
        "w_qkv": w_qkv, "b_qkv": b_qkv,
        "wo": params["wo"].astype(jnp.bfloat16),
        "bo": params["bo"].astype(jnp.float32),
    }


# ---------------------------------------------------------------------------
# SelfAttention forward (mask=None path; dropout = identity in eval mode)
# ---------------------------------------------------------------------------
def self_attention_forward(x, packed, num_heads, *, q_block=512, kv_block=512,
                           out_dtype=jnp.float32):
    # TODO(synk): mask support (masked_fill with -inf before softmax) not wired in.
    B, L, C = x.shape
    D = C // num_heads

    # Fused QKV projection; f32 x is cast to bf16 inside the kernel (no HBM round trip).
    qkv = linear(x.reshape(B * L, C), packed["w_qkv"], packed["b_qkv"],
                 out_dtype=jnp.bfloat16)                  # [B*L, 3C] bf16
    qkv = qkv.reshape(B, L, 3 * C)                        # free reshape, no transpose

    o = attention(qkv, num_heads=num_heads, head_dim=D,
                  q_block=q_block, kv_block=kv_block)     # [B, L, C] bf16
    y = linear(o.reshape(B * L, C), packed["wo"], packed["bo"],
               out_dtype=out_dtype)                       # [B*L, C]
    return y.reshape(B, L, C)


# ---------------------------------------------------------------------------
# Pure-JAX f32 reference for verification
# ---------------------------------------------------------------------------
def reference_forward(x, params, num_heads):
    B, L, C = x.shape
    D = C // num_heads
    scale = 1.0 / math.sqrt(D)
    q = (x @ params["wq"] + params["bq"]).reshape(B, L, num_heads, D)
    k = (x @ params["wk"] + params["bk"]).reshape(B, L, num_heads, D)
    v = (x @ params["wv"] + params["bv"]).reshape(B, L, num_heads, D)
    attn = scale * jnp.einsum("binc,bjnc->bnij", q, k)
    attn = jax.nn.softmax(attn, axis=-1)
    o = jnp.einsum("bnij,bjnc->binc", attn, v).reshape(B, L, C)
    return o @ params["wo"] + params["bo"]


if __name__ == "__main__":
    # C % 128 == 0 exercises the zero-copy QKV split; head_dim=64 exercises head pairing.
    B, L, C, H = 2, 64, 128, 2

    key = jax.random.PRNGKey(0)
    keys = jax.random.split(key, 9)
    init = lambda k, shape: jax.random.normal(k, shape, jnp.float32) * 0.05
    params = {
        "wq": init(keys[0], (C, C)), "bq": init(keys[1], (1, C)),
        "wk": init(keys[2], (C, C)), "bk": init(keys[3], (1, C)),
        "wv": init(keys[4], (C, C)), "bv": init(keys[5], (1, C)),
        "wo": init(keys[6], (C, C)), "bo": init(keys[7], (1, C)),
    }
    x = jax.random.normal(keys[8], (B, L, C), jnp.float32)

    packed = pack_self_attention_params(params, H)   # one-time weight packing

    # Small q/kv blocks so the query-tile grid axis and the multi-step online
    # softmax are both exercised at this test size.
    fwd = jax.jit(functools.partial(self_attention_forward, num_heads=H,
                                    q_block=32, kv_block=32))
    out = jax.block_until_ready(fwd(x, packed))

    ref = reference_forward(x, params, H)
    assert out.shape == (B, L, C)
    # bf16 matmul operands (f32 accumulation) + approx reciprocal in the softmax
    # denominator -> tolerance loosened vs the f32 reference.
    assert jnp.allclose(out, ref, atol=2e-2, rtol=2e-2), "mismatch vs reference"

    print("KERNEL_OK")
</pallas_src>

<mosaic_0001>
module attributes {stable_mosaic.version = 11 : i64} {
  func.func @_linear_kernel(%arg0: i32, %arg1: i32, %arg2: i32, %arg3: memref<128x128xf32, #tpu.memory_space<vmem>>, %arg4: memref<128x384xbf16, #tpu.memory_space<vmem>>, %arg5: memref<1x384xf32, #tpu.memory_space<vmem>>, %arg6: memref<128x384xbf16, #tpu.memory_space<vmem>>, %arg7: memref<128x384xf32, #tpu.memory_space<vmem>>) attributes {dimension_semantics = [#tpu.dimension_semantics<parallel>, #tpu.dimension_semantics<parallel>, #tpu.dimension_semantics<arbitrary>], iteration_bounds = array<i64: 1, 1, 1>, scalar_prefetch = 0 : i64, scratch_operands = 1 : i64, tpu.core_type = #tpu.core_type<tc>, window_params = [{transform_indices = @transform_0, window_bounds = array<i64: 128, 128>}, {transform_indices = @transform_1, window_bounds = array<i64: 128, 384>}, {transform_indices = @transform_2, window_bounds = array<i64: 1, 384>}, {transform_indices = @transform_3, window_bounds = array<i64: 128, 384>}]} {
    %c0_i32 = arith.constant 0 : i32
    %0 = arith.cmpi eq, %arg2, %c0_i32 : i32
    %1 = arith.extui %0 : i1 to i32
    %c0_i32_0 = arith.constant 0 : i32
    %2 = arith.cmpi ne, %1, %c0_i32_0 : i32
    scf.if %2 {
      %cst_10 = arith.constant 0.000000e+00 : f32
      %13 = vector.broadcast %cst_10 : f32 to vector<128x384xf32>
      %c0_11 = arith.constant 0 : index
      %c0_12 = arith.constant 0 : index
      %14 = vector.load %arg7[%c0_11, %c0_12] : memref<128x384xf32, #tpu.memory_space<vmem>>, vector<128x384xf32>
      tpu.vector_store %arg7[%c0_11, %c0_12], %13 {strides = array<i32>} : memref<128x384xf32, #tpu.memory_space<vmem>>, vector<128x384xf32>,
    } else {
    }
    %c0 = arith.constant 0 : index
    %c0_1 = arith.constant 0 : index
    %3 = vector.load %arg7[%c0, %c0_1] : memref<128x384xf32, #tpu.memory_space<vmem>>, vector<128x384xf32>
    %c0_2 = arith.constant 0 : index
    %c0_3 = arith.constant 0 : index
    %4 = vector.load %arg3[%c0_2, %c0_3] : memref<128x128xf32, #tpu.memory_space<vmem>>, vector<128x128xf32>
    %5 = arith.truncf %4 : vector<128x128xf32> to vector<128x128xbf16>
    %c0_4 = arith.constant 0 : index
    %c0_5 = arith.constant 0 : index
    %6 = vector.load %arg4[%c0_4, %c0_5] : memref<128x384xbf16, #tpu.memory_space<vmem>>, vector<128x384xbf16>
    %cst = arith.constant dense<0.000000e+00> : vector<128x384xf32>
    %7 = tpu.matmul %5, %6, %cst {dimension_numbers = #tpu.dot_dimension_numbers<[1], [0], [0], [1], [0, 0, 1, 1], [], []>} : vector<128x128xbf16>, vector<128x384xbf16>, vector<128x384xf32> -> vector<128x384xf32>
    %8 = arith.addf %3, %7 : vector<128x384xf32>
    %c0_6 = arith.constant 0 : index
    %c0_7 = arith.constant 0 : index
    %9 = vector.load %arg7[%c0_6, %c0_7] : memref<128x384xf32, #tpu.memory_space<vmem>>, vector<128x384xf32>
    tpu.vector_store %arg7[%c0_6, %c0_7], %8 {strides = array<i32>} : memref<128x384xf32, #tpu.memory_space<vmem>>, vector<128x384xf32>,
    %c0_i32_8 = arith.constant 0 : i32
    %10 = arith.cmpi eq, %arg2, %c0_i32_8 : i32
    %11 = arith.extui %10 : i1 to i32
    %c0_i32_9 = arith.constant 0 : i32
    %12 = arith.cmpi ne, %11, %c0_i32_9 : i32
    scf.if %12 {
      %c0_10 = arith.constant 0 : index
      %c0_11 = arith.constant 0 : index
      %13 = vector.load %arg7[%c0_10, %c0_11] : memref<128x384xf32, #tpu.memory_space<vmem>>, vector<128x384xf32>
      %c0_12 = arith.constant 0 : index
      %c0_13 = arith.constant 0 : index
      %14 = vector.load %arg5[%c0_12, %c0_13] : memref<1x384xf32, #tpu.memory_space<vmem>>, vector<1x384xf32>
      %15 = vector.broadcast %14 : vector<1x384xf32> to vector<128x384xf32>
      %16 = arith.addf %13, %15 : vector<128x384xf32>
      %17 = arith.truncf %16 : vector<128x384xf32> to vector<128x384xbf16>
      %c0_14 = arith.constant 0 : index
      %c0_15 = arith.constant 0 : index
      %18 = vector.load %arg6[%c0_14, %c0_15] : memref<128x384xbf16, #tpu.memory_space<vmem>>, vector<128x384xbf16>
      tpu.vector_store %arg6[%c0_14, %c0_15], %17 {strides = array<i32>} : memref<128x384xbf16, #tpu.memory_space<vmem>>, vector<128x384xbf16>,
    } else {
    }
    return
  }
  func.func @transform_0(%arg0: i32, %arg1: i32, %arg2: i32) -> (i32, i32) {
    %c0_i32 = arith.constant 0 : i32
    return %arg0, %arg2 : i32, i32
  }
  func.func @transform_1(%arg0: i32, %arg1: i32, %arg2: i32) -> (i32, i32) {
    %c0_i32 = arith.constant 0 : i32
    return %arg2, %arg1 : i32, i32
  }
  func.func @transform_2(%arg0: i32, %arg1: i32, %arg2: i32) -> (i32, i32) {
    %c0_i32 = arith.constant 0 : i32
    %c0_i32_0 = arith.constant 0 : i32
    return %c0_i32, %arg1 : i32, i32
  }
  func.func @transform_3(%arg0: i32, %arg1: i32, %arg2: i32) -> (i32, i32) {
    %c0_i32 = arith.constant 0 : i32
    return %arg0, %arg1 : i32, i32
  }
}

module attributes {stable_mosaic.version = 11 : i64} {
  func.func @_linear_kernel(%arg0: i32, %arg1: i32, %arg2: i32, %arg3: memref<128x128xbf16, #tpu.memory_space<vmem>>, %arg4: memref<128x128xbf16, #tpu.memory_space<vmem>>, %arg5: memref<1x128xf32, #tpu.memory_space<vmem>>, %arg6: memref<128x128xf32, #tpu.memory_space<vmem>>, %arg7: memref<128x128xf32, #tpu.memory_space<vmem>>) attributes {dimension_semantics = [#tpu.dimension_semantics<parallel>, #tpu.dimension_semantics<parallel>, #tpu.dimension_semantics<arbitrary>], iteration_bounds = array<i64: 1, 1, 1>, scalar_prefetch = 0 : i64, scratch_operands = 1 : i64, tpu.core_type = #tpu.core_type<tc>, window_params = [{transform_indices = @transform_0, window_bounds = array<i64: 128, 128>}, {transform_indices = @transform_1, window_bounds = array<i64: 128, 128>}, {transform_indices = @transform_2, window_bounds = array<i64: 1, 128>}, {transform_indices = @transform_3, window_bounds = array<i64: 128, 128>}]} {
    %c0_i32 = arith.constant 0 : i32
    %0 = arith.cmpi eq, %arg2, %c0_i32 : i32
    %1 = arith.extui %0 : i1 to i32
    %c0_i32_0 = arith.constant 0 : i32
    %2 = arith.cmpi ne, %1, %c0_i32_0 : i32
    scf.if %2 {
      %cst_10 = arith.constant 0.000000e+00 : f32
      %12 = vector.broadcast %cst_10 : f32 to vector<128x128xf32>
      %c0_11 = arith.constant 0 : index
      %c0_12 = arith.constant 0 : index
      %13 = vector.load %arg7[%c0_11, %c0_12] : memref<128x128xf32, #tpu.memory_space<vmem>>, vector<128x128xf32>
      tpu.vector_store %arg7[%c0_11, %c0_12], %12 {strides = array<i32>} : memref<128x128xf32, #tpu.memory_space<vmem>>, vector<128x128xf32>,
    } else {
    }
    %c0 = arith.constant 0 : index
    %c0_1 = arith.constant 0 : index
    %3 = vector.load %arg7[%c0, %c0_1] : memref<128x128xf32, #tpu.memory_space<vmem>>, vector<128x128xf32>
    %c0_2 = arith.constant 0 : index
    %c0_3 = arith.constant 0 : index
    %4 = vector.load %arg3[%c0_2, %c0_3] : memref<128x128xbf16, #tpu.memory_space<vmem>>, vector<128x128xbf16>
    %c0_4 = arith.constant 0 : index
    %c0_5 = arith.constant 0 : index
    %5 = vector.load %arg4[%c0_4, %c0_5] : memref<128x128xbf16, #tpu.memory_space<vmem>>, vector<128x128xbf16>
    %cst = arith.constant dense<0.000000e+00> : vector<128x128xf32>
    %6 = tpu.matmul %4, %5, %cst {dimension_numbers = #tpu.dot_dimension_numbers<[1], [0], [0], [1], [0, 0, 1, 1], [], []>} : vector<128x128xbf16>, vector<128x128xbf16>, vector<128x128xf32> -> vector<128x128xf32>
    %7 = arith.addf %3, %6 : vector<128x128xf32>
    %c0_6 = arith.constant 0 : index
    %c0_7 = arith.constant 0 : index
    %8 = vector.load %arg7[%c0_6, %c0_7] : memref<128x128xf32, #tpu.memory_space<vmem>>, vector<128x128xf32>
    tpu.vector_store %arg7[%c0_6, %c0_7], %7 {strides = array<i32>} : memref<128x128xf32, #tpu.memory_space<vmem>>, vector<128x128xf32>,
    %c0_i32_8 = arith.constant 0 : i32
    %9 = arith.cmpi eq, %arg2, %c0_i32_8 : i32
    %10 = arith.extui %9 : i1 to i32
    %c0_i32_9 = arith.constant 0 : i32
    %11 = arith.cmpi ne, %10, %c0_i32_9 : i32
    scf.if %11 {
      %c0_10 = arith.constant 0 : index
      %c0_11 = arith.constant 0 : index
      %12 = vector.load %arg7[%c0_10, %c0_11] : memref<128x128xf32, #tpu.memory_space<vmem>>, vector<128x128xf32>
      %c0_12 = arith.constant 0 : index
      %c0_13 = arith.constant 0 : index
      %13 = vector.load %arg5[%c0_12, %c0_13] : memref<1x128xf32, #tpu.memory_space<vmem>>, vector<1x128xf32>
      %14 = vector.broadcast %13 : vector<1x128xf32> to vector<128x128xf32>
      %15 = arith.addf %12, %14 : vector<128x128xf32>
      %c0_14 = arith.constant 0 : index
      %c0_15 = arith.constant 0 : index
      %16 = vector.load %arg6[%c0_14, %c0_15] : memref<128x128xf32, #tpu.memory_space<vmem>>, vector<128x128xf32>
      tpu.vector_store %arg6[%c0_14, %c0_15], %15 {strides = array<i32>} : memref<128x128xf32, #tpu.memory_space<vmem>>, vector<128x128xf32>,
    } else {
    }
    return
  }
  func.func @transform_0(%arg0: i32, %arg1: i32, %arg2: i32) -> (i32, i32) {
    %c0_i32 = arith.constant 0 : i32
    return %arg0, %arg2 : i32, i32
  }
  func.func @transform_1(%arg0: i32, %arg1: i32, %arg2: i32) -> (i32, i32) {
    %c0_i32 = arith.constant 0 : i32
    return %arg2, %arg1 : i32, i32
  }
  func.func @transform_2(%arg0: i32, %arg1: i32, %arg2: i32) -> (i32, i32) {
    %c0_i32 = arith.constant 0 : i32
    %c0_i32_0 = arith.constant 0 : i32
    return %c0_i32, %arg1 : i32, i32
  }
  func.func @transform_3(%arg0: i32, %arg1: i32, %arg2: i32) -> (i32, i32) {
    %c0_i32 = arith.constant 0 : i32
    return %arg0, %arg1 : i32, i32
  }
}

module attributes {stable_mosaic.version = 11 : i64} {
  func.func @_attn_kernel(%arg0: i32, %arg1: i32, %arg2: i32, %arg3: memref<1x32x128xbf16, #tpu.memory_space<vmem>>, %arg4: memref<1x32x128xbf16, #tpu.memory_space<vmem>>, %arg5: memref<1x32x128xbf16, #tpu.memory_space<vmem>>, %arg6: memref<1x32x128xbf16, #tpu.memory_space<vmem>>, %arg7: memref<32x2xf32, #tpu.memory_space<vmem>>, %arg8: memref<32x2xf32, #tpu.memory_space<vmem>>, %arg9: memref<32x128xf32, #tpu.memory_space<vmem>>) attributes {dimension_semantics = [#tpu.dimension_semantics<parallel>, #tpu.dimension_semantics<parallel>, #tpu.dimension_semantics<arbitrary>], iteration_bounds = array<i64: 2, 2, 2>, scalar_prefetch = 0 : i64, scratch_operands = 3 : i64, tpu.core_type = #tpu.core_type<tc>, window_params = [{transform_indices = @transform_0, window_bounds = array<i64: 1, 32, 128>}, {transform_indices = @transform_1, window_bounds = array<i64: 1, 32, 128>}, {transform_indices = @transform_2, window_bounds = array<i64: 1, 32, 128>}, {transform_indices = @transform_3, window_bounds = array<i64: 1, 32, 128>}]} {
    %c0_i32 = arith.constant 0 : i32
    %0 = arith.cmpi eq, %arg2, %c0_i32 : i32
    %1 = arith.extui %0 : i1 to i32
    %c0_i32_0 = arith.constant 0 : i32
    %2 = arith.cmpi ne, %1, %c0_i32_0 : i32
    scf.if %2 {
      %cst_40 = arith.constant 0xFF800000 : f32
      %68 = vector.broadcast %cst_40 : f32 to vector<32x2xf32>
      %c0_41 = arith.constant 0 : index
      %c0_42 = arith.constant 0 : index
      %69 = vector.load %arg7[%c0_41, %c0_42] : memref<32x2xf32, #tpu.memory_space<vmem>>, vector<32x2xf32>
      tpu.vector_store %arg7[%c0_41, %c0_42], %68 {strides = array<i32>} : memref<32x2xf32, #tpu.memory_space<vmem>>, vector<32x2xf32>,
      %cst_43 = arith.constant 0.000000e+00 : f32
      %70 = vector.broadcast %cst_43 : f32 to vector<32x2xf32>
      %c0_44 = arith.constant 0 : index
      %c0_45 = arith.constant 0 : index
      %71 = vector.load %arg8[%c0_44, %c0_45] : memref<32x2xf32, #tpu.memory_space<vmem>>, vector<32x2xf32>
      tpu.vector_store %arg8[%c0_44, %c0_45], %70 {strides = array<i32>} : memref<32x2xf32, #tpu.memory_space<vmem>>, vector<32x2xf32>,
      %cst_46 = arith.constant 0.000000e+00 : f32
      %72 = vector.broadcast %cst_46 : f32 to vector<32x128xf32>
      %c0_47 = arith.constant 0 : index
      %c0_48 = arith.constant 0 : index
      %73 = vector.load %arg9[%c0_47, %c0_48] : memref<32x128xf32, #tpu.memory_space<vmem>>, vector<32x128xf32>
      tpu.vector_store %arg9[%c0_47, %c0_48], %72 {strides = array<i32>} : memref<32x128xf32, #tpu.memory_space<vmem>>, vector<32x128xf32>,
    } else {
    }
    %c0 = arith.constant 0 : index
    %c0_1 = arith.constant 0 : index
    %c0_2 = arith.constant 0 : index
    %3 = vector.load %arg3[%c0, %c0_1, %c0_2] : memref<1x32x128xbf16, #tpu.memory_space<vmem>>, vector<1x32x64xbf16>
    %4 = vector.shape_cast %3 : vector<1x32x64xbf16> to vector<32x64xbf16>
    %c0_3 = arith.constant 0 : index
    %c0_4 = arith.constant 0 : index
    %c0_5 = arith.constant 0 : index
    %5 = vector.load %arg4[%c0_3, %c0_4, %c0_5] : memref<1x32x128xbf16, #tpu.memory_space<vmem>>, vector<1x32x64xbf16>
    %6 = vector.shape_cast %5 : vector<1x32x64xbf16> to vector<32x64xbf16>
    %c0_6 = arith.constant 0 : index
    %c0_7 = arith.constant 0 : index
    %c0_8 = arith.constant 0 : index
    %7 = vector.load %arg5[%c0_6, %c0_7, %c0_8] : memref<1x32x128xbf16, #tpu.memory_space<vmem>>, vector<1x32x64xbf16>
    %8 = vector.shape_cast %7 : vector<1x32x64xbf16> to vector<32x64xbf16>
    %cst = arith.constant dense<0.000000e+00> : vector<32x32xf32>
    %9 = tpu.matmul %4, %6, %cst {dimension_numbers = #tpu.dot_dimension_numbers<[1], [1], [0], [0], [0, 0, 1, 0], [], []>} : vector<32x64xbf16>, vector<32x64xbf16>, vector<32x32xf32> -> vector<32x32xf32>
    %c0_9 = arith.constant 0 : index
    %c0_10 = arith.constant 0 : index
    %10 = vector.load %arg7[%c0_9, %c0_10] : memref<32x2xf32, #tpu.memory_space<vmem>>, vector<32x1xf32>
    %cst_11 = arith.constant dense<0xFF800000> : vector<32xf32>
    %11 = vector.multi_reduction <maximumf>, %9, %cst_11 [1] : vector<32x32xf32> to vector<32xf32>
    %12 = vector.shape_cast %11 : vector<32xf32> to vector<32x1xf32>
    %13 = arith.maximumf %10, %12 : vector<32x1xf32>
    %14 = arith.subf %10, %13 : vector<32x1xf32>
    %15 = math.exp %14 : vector<32x1xf32>
    %16 = vector.broadcast %13 : vector<32x1xf32> to vector<32x32xf32>
    %17 = arith.subf %9, %16 : vector<32x32xf32>
    %18 = arith.truncf %17 : vector<32x32xf32> to vector<32x32xbf16>
    %19 = math.exp %18 : vector<32x32xbf16>
    %c0_12 = arith.constant 0 : index
    %c0_13 = arith.constant 0 : index
    %20 = vector.load %arg8[%c0_12, %c0_13] : memref<32x2xf32, #tpu.memory_space<vmem>>, vector<32x1xf32>
    %21 = arith.mulf %15, %20 : vector<32x1xf32>
    %22 = arith.extf %19 : vector<32x32xbf16> to vector<32x32xf32>
    %cst_14 = arith.constant dense<0.000000e+00> : vector<32xf32>
    %23 = vector.multi_reduction <add>, %22, %cst_14 [1] : vector<32x32xf32> to vector<32xf32>
    %24 = vector.shape_cast %23 : vector<32xf32> to vector<32x1xf32>
    %25 = arith.addf %21, %24 : vector<32x1xf32>
    %cst_15 = arith.constant dense<0.000000e+00> : vector<32x64xf32>
    %26 = tpu.matmul %19, %8, %cst_15 {dimension_numbers = #tpu.dot_dimension_numbers<[1], [0], [0], [1], [0, 0, 1, 1], [], []>} : vector<32x32xbf16>, vector<32x64xbf16>, vector<32x64xf32> -> vector<32x64xf32>
    %27 = vector.shape_cast %15 : vector<32x1xf32> to vector<32x1xf32>
    %28 = vector.broadcast %27 : vector<32x1xf32> to vector<32x64xf32>
    %c0_16 = arith.constant 0 : index
    %c0_17 = arith.constant 0 : index
    %c64 = arith.constant 64 : index
    %29 = vector.load %arg3[%c0_16, %c0_17, %c64] : memref<1x32x128xbf16, #tpu.memory_space<vmem>>, vector<1x32x64xbf16>
    %30 = vector.shape_cast %29 : vector<1x32x64xbf16> to vector<32x64xbf16>
    %c0_18 = arith.constant 0 : index
    %c0_19 = arith.constant 0 : index
    %c64_20 = arith.constant 64 : index
    %31 = vector.load %arg4[%c0_18, %c0_19, %c64_20] : memref<1x32x128xbf16, #tpu.memory_space<vmem>>, vector<1x32x64xbf16>
    %32 = vector.shape_cast %31 : vector<1x32x64xbf16> to vector<32x64xbf16>
    %c0_21 = arith.constant 0 : index
    %c0_22 = arith.constant 0 : index
    %c64_23 = arith.constant 64 : index
    %33 = vector.load %arg5[%c0_21, %c0_22, %c64_23] : memref<1x32x128xbf16, #tpu.memory_space<vmem>>, vector<1x32x64xbf16>
    %34 = vector.shape_cast %33 : vector<1x32x64xbf16> to vector<32x64xbf16>
    %cst_24 = arith.constant dense<0.000000e+00> : vector<32x32xf32>
    %35 = tpu.matmul %30, %32, %cst_24 {dimension_numbers = #tpu.dot_dimension_numbers<[1], [1], [0], [0], [0, 0, 1, 0], [], []>} : vector<32x64xbf16>, vector<32x64xbf16>, vector<32x32xf32> -> vector<32x32xf32>
    %c0_25 = arith.constant 0 : index
    %c1 = arith.constant 1 : index
    %36 = vector.load %arg7[%c0_25, %c1] : memref<32x2xf32, #tpu.memory_space<vmem>>, vector<32x1xf32>
    %cst_26 = arith.constant dense<0xFF800000> : vector<32xf32>
    %37 = vector.multi_reduction <maximumf>, %35, %cst_26 [1] : vector<32x32xf32> to vector<32xf32>
    %38 = vector.shape_cast %37 : vector<32xf32> to vector<32x1xf32>
    %39 = arith.maximumf %36, %38 : vector<32x1xf32>
    %40 = arith.subf %36, %39 : vector<32x1xf32>
    %41 = math.exp %40 : vector<32x1xf32>
    %42 = vector.broadcast %39 : vector<32x1xf32> to vector<32x32xf32>
    %43 = arith.subf %35, %42 : vector<32x32xf32>
    %44 = arith.truncf %43 : vector<32x32xf32> to vector<32x32xbf16>
    %45 = math.exp %44 : vector<32x32xbf16>
    %c0_27 = arith.constant 0 : index
    %c1_28 = arith.constant 1 : index
    %46 = vector.load %arg8[%c0_27, %c1_28] : memref<32x2xf32, #tpu.memory_space<vmem>>, vector<32x1xf32>
    %47 = arith.mulf %41, %46 : vector<32x1xf32>
    %48 = arith.extf %45 : vector<32x32xbf16> to vector<32x32xf32>
    %cst_29 = arith.constant dense<0.000000e+00> : vector<32xf32>
    %49 = vector.multi_reduction <add>, %48, %cst_29 [1] : vector<32x32xf32> to vector<32xf32>
    %50 = vector.shape_cast %49 : vector<32xf32> to vector<32x1xf32>
    %51 = arith.addf %47, %50 : vector<32x1xf32>
    %cst_30 = arith.constant dense<0.000000e+00> : vector<32x64xf32>
    %52 = tpu.matmul %45, %34, %cst_30 {dimension_numbers = #tpu.dot_dimension_numbers<[1], [0], [0], [1], [0, 0, 1, 1], [], []>} : vector<32x32xbf16>, vector<32x64xbf16>, vector<32x64xf32> -> vector<32x64xf32>
    %53 = vector.shape_cast %41 : vector<32x1xf32> to vector<32x1xf32>
    %54 = vector.broadcast %53 : vector<32x1xf32> to vector<32x64xf32>
    %55 = tpu.concatenate %28, %54 in 1 : vector<32x64xf32>, vector<32x64xf32> -> vector<32x128xf32>
    %c0_31 = arith.constant 0 : index
    %c0_32 = arith.constant 0 : index
    %56 = vector.load %arg9[%c0_31, %c0_32] : memref<32x128xf32, #tpu.memory_space<vmem>>, vector<32x128xf32>
    %57 = arith.mulf %55, %56 : vector<32x128xf32>
    %58 = tpu.concatenate %26, %52 in 1 : vector<32x64xf32>, vector<32x64xf32> -> vector<32x128xf32>
    %59 = arith.addf %57, %58 : vector<32x128xf32>
    %c0_33 = arith.constant 0 : index
    %c0_34 = arith.constant 0 : index
    %60 = vector.load %arg9[%c0_33, %c0_34] : memref<32x128xf32, #tpu.memory_space<vmem>>, vector<32x128xf32>
    tpu.vector_store %arg9[%c0_33, %c0_34], %59 {strides = array<i32>} : memref<32x128xf32, #tpu.memory_space<vmem>>, vector<32x128xf32>,
    %61 = tpu.concatenate %13, %39 in 1 : vector<32x1xf32>, vector<32x1xf32> -> vector<32x2xf32>
    %c0_35 = arith.constant 0 : index
    %c0_36 = arith.constant 0 : index
    %62 = vector.load %arg7[%c0_35, %c0_36] : memref<32x2xf32, #tpu.memory_space<vmem>>, vector<32x2xf32>
    tpu.vector_store %arg7[%c0_35, %c0_36], %61 {strides = array<i32>} : memref<32x2xf32, #tpu.memory_space<vmem>>, vector<32x2xf32>,
    %63 = tpu.concatenate %25, %51 in 1 : vector<32x1xf32>, vector<32x1xf32> -> vector<32x2xf32>
    %c0_37 = arith.constant 0 : index
    %c0_38 = arith.constant 0 : index
    %64 = vector.load %arg8[%c0_37, %c0_38] : memref<32x2xf32, #tpu.memory_space<vmem>>, vector<32x2xf32>
    tpu.vector_store %arg8[%c0_37, %c0_38], %63 {strides = array<i32>} : memref<32x2xf32, #tpu.memory_space<vmem>>, vector<32x2xf32>,
    %c1_i32 = arith.constant 1 : i32
    %65 = arith.cmpi eq, %arg2, %c1_i32 : i32
    %66 = arith.extui %65 : i1 to i32
    %c0_i32_39 = arith.constant 0 : i32
    %67 = arith.cmpi ne, %66, %c0_i32_39 : i32
    scf.if %67 {
      %c0_40 = arith.constant 0 : index
      %c0_41 = arith.constant 0 : index
      %68 = vector.load %arg8[%c0_40, %c0_41] : memref<32x2xf32, #tpu.memory_space<vmem>>, vector<32x1xf32>
      %69 = tpu.reciprocal %68 {approx = true} : vector<32x1xf32> -> vector<32x1xf32>
      %c0_42 = arith.constant 0 : index
      %c0_43 = arith.constant 0 : index
      %70 = vector.load %arg9[%c0_42, %c0_43] : memref<32x128xf32, #tpu.memory_space<vmem>>, vector<32x64xf32>
      %71 = vector.broadcast %69 : vector<32x1xf32> to vector<32x64xf32>
      %72 = arith.mulf %70, %71 : vector<32x64xf32>
      %c0_44 = arith.constant 0 : index
      %c1_45 = arith.constant 1 : index
      %73 = vector.load %arg8[%c0_44, %c1_45] : memref<32x2xf32, #tpu.memory_space<vmem>>, vector<32x1xf32>
      %74 = tpu.reciprocal %73 {approx = true} : vector<32x1xf32> -> vector<32x1xf32>
      %c0_46 = arith.constant 0 : index
      %c64_47 = arith.constant 64 : index
      %75 = vector.load %arg9[%c0_46, %c64_47] : memref<32x128xf32, #tpu.memory_space<vmem>>, vector<32x64xf32>
      %76 = vector.broadcast %74 : vector<32x1xf32> to vector<32x64xf32>
      %77 = arith.mulf %75, %76 : vector<32x64xf32>
      %78 = tpu.concatenate %72, %77 in 1 : vector<32x64xf32>, vector<32x64xf32> -> vector<32x128xf32>
      %79 = arith.truncf %78 : vector<32x128xf32> to vector<32x128xbf16>
      %c0_48 = arith.constant 0 : index
      %c0_49 = arith.constant 0 : index
      %c0_50 = arith.constant 0 : index
      %80 = vector.load %arg6[%c0_48, %c0_49, %c0_50] : memref<1x32x128xbf16, #tpu.memory_space<vmem>>, vector<1x32x128xbf16>
      %81 = vector.shape_cast %80 : vector<1x32x128xbf16> to vector<32x128xbf16>
      %82 = vector.shape_cast %79 : vector<32x128xbf16> to vector<1x32x128xbf16>
      tpu.vector_store %arg6[%c0_48, %c0_49, %c0_50], %82 {strides = array<i32>} : memref<1x32x128xbf16, #tpu.memory_space<vmem>>, vector<1x32x128xbf16>,
    } else {
    }
    return
  }
  func.func @transform_0(%arg0: i32, %arg1: i32, %arg2: i32) -> (i32, i32, i32) {
    %c0_i32 = arith.constant 0 : i32
    %c0_i32_0 = arith.constant 0 : i32
    return %arg0, %arg1, %c0_i32 : i32, i32, i32
  }
  func.func @transform_1(%arg0: i32, %arg1: i32, %arg2: i32) -> (i32, i32, i32) {
    %c1_i32 = arith.constant 1 : i32
    %c0_i32 = arith.constant 0 : i32
    return %arg0, %arg2, %c1_i32 : i32, i32, i32
  }
  func.func @transform_2(%arg0: i32, %arg1: i32, %arg2: i32) -> (i32, i32, i32) {
    %c2_i32 = arith.constant 2 : i32
    %c0_i32 = arith.constant 0 : i32
    return %arg0, %arg2, %c2_i32 : i32, i32, i32
  }
  func.func @transform_3(%arg0: i32, %arg1: i32, %arg2: i32) -> (i32, i32, i32) {
    %c0_i32 = arith.constant 0 : i32
    %c0_i32_0 = arith.constant 0 : i32
    return %arg0, %arg1, %c0_i32 : i32, i32, i32
  }
}

</mosaic_0001>

<bundles_post_ra>
// kernel: self_attention_forward.5
= control target key start
LH: loop header
LB: loop body
LE: loop exit
PB: predicated region body
PF: predicated region fallthrough
CT: control target
= control target key end

     0   :  { %s593_s0 = inlined_call_operand.vmem [shape: bf16[128,128], index: 0, kind: input, shape index: {}]   ;;  %s594_s1 = inlined_call_operand.vmem [shape: bf16[128,128], index: 1, kind: input, shape index: {}]   ;;  %s595_s2 = inlined_call_operand.vmem [shape: f32[1,128], index: 2, kind: input, shape index: {}]   ;;  %s596_s3 = inlined_call_operand.hbm [shape: f32[128,128], index: 3, kind: output, shape index: {}]  }
   0x1   :  { %v467_v0 = vld [vmem:[%s594_s1] sm:$0xff]   ;;  %v468_v1 = vld [vmem:[%s594_s1 + $0x8] sm:$0xff]   ;;  %v469_v2 = vld [vmem:[%s594_s1 + $0x10] sm:$0xff]  }
   0x2   :  { %416 = vmatprep.subr.bf16.mxu0 %v467_v0  ;;  %448 = vmatprep.subr.bf16.mxu1 %v467_v0  ;;  %v470_v3 = vld [vmem:[%s594_s1 + $0x18] sm:$0xff]   ;;  %v475_v4 = vld [vmem:[%s593_s0] sm:$0xff]   ;;  %v472_v7 = vld [vmem:[%s594_s1 + $0x28] sm:$0xff]  }
   0x3   :  { %417 = vmatpush3.bf16.msra.mxu0 %v467_v0  ;;  %456 = vmatpush3.bf16.msra.mxu1 %v467_v0  ;;  %v476_v5 = vld [vmem:[%s593_s0 + $0x20] sm:$0xff]  }
   0x4   :  { %418 = vmatprep.subr.bf16.mxu0 %v468_v1  ;;  %449 = vmatprep.subr.bf16.mxu1 %v468_v1  ;;  %v471_v6 = vld [vmem:[%s594_s1 + $0x20] sm:$0xff]  }
   0x5   :  { %432 = vmatprep.mubr.bf16.mxu0 %v475_v4  ;;  %440 = vmatprep.mubr.bf16.mxu1 %v476_v5 }
   0x7   :  { %419 = vmatpush3.bf16.msra.mxu0 %v468_v1  ;;  %457 = vmatpush3.bf16.msra.mxu1 %v468_v1 }
   0x8   :  { %420 = vmatprep.subr.bf16.mxu0 %v469_v2  ;;  %450 = vmatprep.subr.bf16.mxu1 %v469_v2 }
   0xb   :  { %421 = vmatpush3.bf16.msra.mxu0 %v469_v2  ;;  %458 = vmatpush3.bf16.msra.mxu1 %v469_v2 }
   0xc   :  { %422 = vmatprep.subr.bf16.mxu0 %v470_v3  ;;  %451 = vmatprep.subr.bf16.mxu1 %v470_v3 }
   0xf   :  { %423 = vmatpush3.bf16.msra.mxu0 %v470_v3  ;;  %459 = vmatpush3.bf16.msra.mxu1 %v470_v3 }
  0x10   :  { %424 = vmatprep.subr.bf16.mxu0 %v471_v6  ;;  %452 = vmatprep.subr.bf16.mxu1 %v471_v6 }
  0x11   :  { %8 = vsyncpa [#allocation4], 0  ;;  %v473_v8 = vld [vmem:[%s594_s1 + $0x30] sm:$0xff]   ;;  %v474_v9 = vld [vmem:[%s594_s1 + $0x38] sm:$0xff]  }
  0x12   :  { %v477_v10 = vld [vmem:[%s593_s0 + $0x8] sm:$0xff]   ;;  %v479_v12 = vld [vmem:[%s593_s0 + $0x10] sm:$0xff]   ;;  %v481_v14 = vld [vmem:[%s593_s0 + $0x18] sm:$0xff]  }
  0x13   :  { %425 = vmatpush3.bf16.msra.mxu0 %v471_v6  ;;  %460 = vmatpush3.bf16.msra.mxu1 %v471_v6  ;;  %v478_v11 = vld [vmem:[%s593_s0 + $0x28] sm:$0xff]   ;;  %v480_v13 = vld [vmem:[%s593_s0 + $0x30] sm:$0xff]   ;;  %v482_v15 = vld [vmem:[%s593_s0 + $0x38] sm:$0xff]   ;;  %s507_s0 = smov [#allocation3]  }
  0x14   :  { %426 = vmatprep.subr.bf16.mxu0 %v472_v7  ;;  %453 = vmatprep.subr.bf16.mxu1 %v472_v7  ;;  %v399_v16 = vld [vmem:[%s595_s2] ss:$0 sm:$0xff]  ;;  %s372_s2 = sshll.u32 %s507_s0, 4  ;;  %s373_s2 = int_to_ptr.vmem [resolvable:$true] %s372_s2 }
  0x15   :  { %s483_s18 = scalar_lea.vmem %s373_s2, 2048  ;;  %p488_p1 = scmp.lt.s32.totalorder %s373_s2, %s373_s2 }
  0x16   :  { %p484_p0 = scmp.ne.s32.totalorder %s373_s2, %s483_s18  ;;  %p489_p2 = scmp.lt.s32.totalorder %s483_s18, %s483_s18 }
  0x17   :  { %427 = vmatpush3.bf16.msra.mxu0 %v472_v7  ;;  %461 = vmatpush3.bf16.msra.mxu1 %v472_v7 }
  0x18   :  { %428 = vmatprep.subr.bf16.mxu0 %v473_v8  ;;  %454 = vmatprep.subr.bf16.mxu1 %v473_v8  ;;  %p490_p3 = por %p489_p2, %p488_p1 }
  0x1a   :  { %p491_p4 = pnand %p490_p3, %p484_p0 }
  0x1b   :  { %429 = vmatpush3.bf16.msra.mxu0 %v473_v8  ;;  %462 = vmatpush3.bf16.msra.mxu1 %v473_v8 }
  0x1c   :  { %430 = vmatprep.subr.bf16.mxu0 %v474_v9  ;;  %455 = vmatprep.subr.bf16.mxu1 %v474_v9 }
  0x1f   :  { %431 = vmatpush3.bf16.msra.mxu0 %v474_v9  ;;  %463 = vmatpush3.bf16.msra.mxu1 %v474_v9 }
  0x22   :  { %433 = vmatmul.mubr.bf16.vlgmr.msra.gmra.mrb[0].mxu0 %v477_v10  ;;  %441 = vmatmul.mubr.bf16.vlgmr.msra.gmra.mrb[0].mxu1 %v478_v11 }
  0x23   :  { %436 = vmatprep.mubr.bf16.mxu0 %v479_v12  ;;  %444 = vmatprep.mubr.bf16.mxu1 %v480_v13 }
  0x2a   :  { %437 = vmatmul.mubr.bf16.gmra.mrb[4].mxu0 %v481_v14  ;;  %445 = vmatmul.mubr.bf16.gmra.mrb[4].mxu1 %v482_v15 }
  0xf5   :  { %v434_v17 = vpop.f32.mrb[0].mxu0  ;;  %v442_v18 = vpop.f32.mrb[0].mxu1 }
  0xf6   :  { %v337_v19 = vadd.f32 %v434_v17, %v399_v16  ;;  %v345_v20 = vadd.f32 %v442_v18, %v399_v16  ;;  %v214_v21 = vpop.f32.mrb[1].mxu0  ;;  %v246_v22 = vpop.f32.mrb[1].mxu1 }
  0xf7   :  { %v335_v23 = vadd.f32 %v399_v16, %v214_v21  ;;  %v343_v24 = vadd.f32 %v399_v16, %v246_v22  ;;  %v435_v25 = vpop.f32.mrb[2].mxu0  ;;  %v443_v26 = vpop.f32.mrb[2].mxu1 }
  0xf8   :  { %353 = vst [vmem:[#allocation3 + $0x10] sm:$0xff] %v337_v19  ;;  %361 = vst [vmem:[#allocation3 + $0x50] sm:$0xff] %v345_v20  ;;  %v338_v27 = vadd.f32 %v435_v25, %v399_v16  ;;  %v346_v28 = vadd.f32 %v443_v26, %v399_v16  ;;  %v217_v29 = vpop.f32.mrb[3].mxu0  ;;  %v249_v30 = vpop.f32.mrb[3].mxu1 }
  0xf9   :  { %351 = vst [vmem:[#allocation3] sm:$0xff] %v335_v23  ;;  %359 = vst [vmem:[#allocation3 + $0x40] sm:$0xff] %v343_v24  ;;  %v336_v31 = vadd.f32 %v399_v16, %v217_v29  ;;  %v344_v32 = vadd.f32 %v399_v16, %v249_v30 }
  0xfa   :  { %354 = vst [vmem:[#allocation3 + $0x18] sm:$0xff] %v338_v27  ;;  %362 = vst [vmem:[#allocation3 + $0x58] sm:$0xff] %v346_v28 }
  0xfb   :  { %352 = vst [vmem:[#allocation3 + $0x8] sm:$0xff] %v336_v31  ;;  %360 = vst [vmem:[#allocation3 + $0x48] sm:$0xff] %v344_v32 }
  0xfd   :  { %v438_v33 = vpop.f32.mrb[4].mxu0  ;;  %v446_v34 = vpop.f32.mrb[4].mxu1 }
  0xfe   :  { %v341_v35 = vadd.f32 %v438_v33, %v399_v16  ;;  %v349_v36 = vadd.f32 %v446_v34, %v399_v16  ;;  %v230_v37 = vpop.f32.mrb[5].mxu0  ;;  %v262_v38 = vpop.f32.mrb[5].mxu1 }
  0xff   :  { %v339_v39 = vadd.f32 %v399_v16, %v230_v37  ;;  %v347_v40 = vadd.f32 %v399_v16, %v262_v38  ;;  %v439_v41 = vpop.f32.mrb[6].mxu0  ;;  %v447_v42 = vpop.f32.mrb[6].mxu1 }
 0x100   :  { %357 = vst [vmem:[#allocation3 + $0x30] sm:$0xff] %v341_v35  ;;  %365 = vst [vmem:[#allocation3 + $0x70] sm:$0xff] %v349_v36  ;;  %v342_v43 = vadd.f32 %v439_v41, %v399_v16  ;;  %v350_v44 = vadd.f32 %v447_v42, %v399_v16  ;;  %v233_v45 = vpop.f32.mrb[7].mxu0  ;;  %v265_v46 = vpop.f32.mrb[7].mxu1 }
 0x101   :  { %355 = vst [vmem:[#allocation3 + $0x20] sm:$0xff] %v339_v39  ;;  %363 = vst [vmem:[#allocation3 + $0x60] sm:$0xff] %v347_v40  ;;  %v340_v47 = vadd.f32 %v399_v16, %v233_v45  ;;  %v348_v48 = vadd.f32 %v399_v16, %v265_v46 }
 0x102   :  { %358 = vst [vmem:[#allocation3 + $0x38] sm:$0xff] %v342_v43  ;;  %366 = vst [vmem:[#allocation3 + $0x78] sm:$0xff] %v350_v44 }
 0x103   :  { %356 = vst [vmem:[#allocation3 + $0x28] sm:$0xff] %v340_v47  ;;  %364 = vst [vmem:[#allocation3 + $0x68] sm:$0xff] %v348_v48 }
 0x104   :  { %494 = shalt.err (!%p491_p4)
}
 0x105   :  { %s495_s21 = scalar_lea.hbm %s596_s3, 2048 }
 0x106   :  { %p496_p5 = scmp.ne.s32.totalorder %s596_s3, %s495_s21  ;;  %p499_p6 = scmp.lt.u32.totalorder %s495_s21, %s596_s3 }
 0x108   :  { %p501_p7 = pnand %p499_p6, %p496_p5 }
 0x10a   :  { %504 = shalt.err (!%p501_p7)
}
 0x10b   :  { %s508_s26 = smov 128   ;;  %s509_s27 = smov 8  }
 0x10c   :  { %378 = dma.vmem_to_hbm [thread:$0]  %s373_s2, 2048, %s596_s3, [#allocation4], %s508_s26, %s508_s26, %s509_s27  }
 0x10d   :  { %505 = dma.done.wait [#allocation4], 2048  }
 0x10e   :  { %506 = vsyncadd [#allocation4], 4294965248 }
 0x10f   :  { %382 = vsyncpa [#allocation4], 1 }

// kernel: self_attention_forward.4
= control target key start
LH: loop header
LB: loop body
LE: loop exit
PB: predicated region body
PF: predicated region fallthrough
CT: control target
= control target key end

     0   :  { %s1612_s12 = smov 0   ;;  %s1614_s13 = smov 0   ;;  %s1984_s0 = inlined_call_operand.vmem [shape: bf16[2,64,384], index: 0, kind: input, shape index: {}, may-alias: {0,1,2}]   ;;  %s1985_s1 = inlined_call_operand.vmem [shape: bf16[2,64,384], index: 1, kind: input, shape index: {}, may-alias: {0,1,2}]   ;;  %s1986_s2 = inlined_call_operand.vmem [shape: bf16[2,64,384], index: 2, kind: input, shape index: {}, may-alias: {0,1,2}]   ;;  %s1987_s3 = inlined_call_operand.vmem [shape: bf16[2,64,128], index: 3, kind: output, shape index: {}]  }
   0x1   :  { %s1616_s14 = smov 0   ;;  %s1618_s15 = smov 0  }
   0x2   :  { %s1620_s16 = smov 0   ;;  %s1622_s17 = smov 0  }
   0x3   :  { %s1624_s18 = smov 0   ;;  %s1626_s19 = smov 0  }
   0x4   :  { %s1628_s20 = smov 0   ;;  %s1630_s21 = smov 0  }
   0x5   :  { %s1632_s22 = smov 0  }
   0x6 LB: > { %s25_s23 = sadd.s32 1, %s1571_s19  ;;  %s28_s24 = sadd.s32 1, %s1575_s20  ;;  %s1583_s22 = sphi %s1632_s22, %s13_s22   ;;  %s1579_s21 = sphi %s1630_s21, %s2002_s21   ;;  %s1575_s20 = sphi %s1628_s20, %s2001_s20   ;;  %s1571_s19 = sphi %s1626_s19, %s2000_s19   ;;  %s1567_s18 = sphi %s1624_s18, %s1999_s18   ;;  %s1563_s17 = sphi %s1622_s17, %s1998_s17   ;;  %s1559_s16 = sphi %s1620_s16, %s1997_s16   ;;  %s1555_s15 = sphi %s1618_s15, %s1996_s15   ;;  %s1551_s14 = sphi %s1616_s14, %s1995_s14   ;;  %s1547_s13 = sphi %s1614_s13, %s1994_s13   ;;  %s1543_s12 = sphi %s1612_s12, %s1993_s12  }
   0x7   : > { %p26_p0 = scmp.ge.s32.totalorder %s25_s23, 2  ;;  %p48_p1 = scmp.ne.s32.totalorder %s1555_s15, %s1551_s14 }
   0x8   : > { %p49_p2 = scmp.eq.s32.totalorder %s1583_s22, 0  ;;  %s32_s25 = sadd.s32 1, %s1579_s21 }
   0x9   : > { %s2004_s23 = smov (%p26_p0, %s25_s23), 0  ;;  %s2006_s24 = smov (!%p26_p0, %s28_s24), %s1575_s20 }
   0xa   : > { %p30_p3 = scmp.ge.s32.totalorder %s2006_s24, 2  ;;  %p1676_p4 = por %p49_p2, %p48_p1 }
   0xb   : > { %p76_p5 = scmp.ne.s32.totalorder %s1547_s13, %s1543_s12  ;;  %s65_s29 = ssub.s32 %s1571_s19, %s2004_s23 }
   0xc   : > { %s2008_s24 = smov (%p30_p3, %s2006_s24), 0  ;;  %s2010_s25 = smov (!%p30_p3, %s32_s25), %s1579_s21 }
   0xd   : > { %p1685_p6 = por %p76_p5, %p49_p2  ;;  %p34_p7 = scmp.ge.s32.totalorder %s2010_s25, 2 }
   0xe   : > { %s37_s28 = ssub.s32 %s1575_s20, %s2008_s24  ;;  %s41_s30 = sadd.s32 1, %s1555_s15 }
   0xf   : > { %s2012_s25 = smov (%p34_p7, %s2010_s25), 0  ;;  %s69_s5 = sadd.s32 1, %s1547_s13 }
  0x10   : > { %1991 = sst [smem:[#allocation8_spill]] %s2012_s25  ;;  %s36_s4 = ssub.s32 %s1579_s21, %s2012_s25 }
  0x11   : > { %s38_s6 = sor.u32 %s37_s28, %s36_s4  ;;  %s66_s7 = sor.u32 %s65_s29, %s36_s4 }
  0x12   : > { %p39_p8 = scmp.eq.s32.totalorder %s38_s6, 0  ;;  %p67_p9 = scmp.eq.s32.totalorder %s66_s7, 0 }
  0x13   : > { %p1237_p10 = scmp.ge.s32.totalorder %s1583_s22, 8 }
  0x14   : > { %s1700_s8 = scalar_select %p39_p8, %s1555_s15, %s41_s30  }
  0x15   : > { %s1703_s9 = scalar_select %p67_p9, %s1547_s13, %s69_s5  }
  0x16   : > { %158 = sbr.rel (%p1237_p10) target bundleno = 59 (0x3b), region = 16 }
  0x1d   : > { %161 = sbr.rel (!%p1676_p4) target bundleno = 39 (0x27), region = 20  ;;  %s163_s10 = sand.u32 (%p1676_p4), 1, %s1555_s15  }
  0x1e   : > { %s1350_s11 = smul.u32 (%p1676_p4), 12, %s1575_s20  ;;  %s1238_s25 = sshll.u32 (%p1676_p4), %s163_s10, 4 }
  0x1f   : > { %s1351_s28 = smul.u32 (%p1676_p4), 24, %s1579_s21  ;;  %s165_s7 = scalar_lea.vmem (%p1676_p4), [#allocation5], %s1238_s25 }
  0x21   : > { %s169_s29 = sadd.s32 (%p1676_p4), %s1351_s28, %s1350_s11 }
  0x22   : > { %s1241_s4 = sshll.u32 (%p1676_p4), %s169_s29, 2 }
  0x23   : > { %s171_s5 = scalar_lea.vmem (%p1676_p4), %s1984_s0, %s1241_s4 }
  0x24   : > { %v187_v0 = vld [vmem:[%s171_s5] sm:$0xf]  ;;  %v189_v1 = vld [vmem:[%s171_s5 + $0xc] sm:$0xf]  ;;  %v191_v2 = vld [vmem:[%s171_s5 + $0x18] sm:$0xf] }
  0x25   : > { %188 = vst [vmem:[%s165_s7] sm:$0xf] %v187_v0  ;;  %190 = vst [vmem:[%s165_s7 + $0x4] sm:$0xf] %v189_v1  ;;  %v193_v3 = vld [vmem:[%s171_s5 + $0x24] sm:$0xf] }
  0x26   : > { %192 = vst [vmem:[%s165_s7 + $0x8] sm:$0xf] %v191_v2  ;;  %194 = vst [vmem:[%s165_s7 + $0xc] sm:$0xf] %v193_v3 }
  0x27 PF: > { %225 = sbr.rel (!%p1685_p6) target bundleno = 49 (0x31), region = 61  ;;  %s227_s26 = sand.u32 (%p1685_p6), 1, %s1547_s13  }
  0x28   : > { %s1130_s10 = smul.u32 (%p1685_p6), 12, %s1571_s19  ;;  %s1242_s11 = sshll.u32 (%p1685_p6), %s227_s26, 4 }
  0x29   : > { %s1131_s28 = smul.u32 (%p1685_p6), 24, %s1579_s21  ;;  %s229_s5 = scalar_lea.vmem (%p1685_p6), [#allocation6], %s1242_s11 }
  0x2b   : > { %s1132_s29 = sadd.s32 (%p1685_p6), %s1131_s28, %s1130_s10 }
  0x2c   : > { %s1243_s4 = sshll.u32 (%p1685_p6), %s1132_s29, 2 }
  0x2d   : > { %s1134_s30 = scalar_lea.vmem (%p1685_p6), %s1985_s1, %s1243_s4 }
  0x2e   : > { %v1244_v4 = vld [vmem:[%s1134_s30 + $0x4] sm:$0xf]  ;;  %v1245_v5 = vld [vmem:[%s1134_s30 + $0x10] sm:$0xf]  ;;  %v1246_v6 = vld [vmem:[%s1134_s30 + $0x1c] sm:$0xf] }
  0x2f   : > { %253 = vst [vmem:[%s229_s5] sm:$0xf] %v1244_v4  ;;  %255 = vst [vmem:[%s229_s5 + $0x4] sm:$0xf] %v1245_v5  ;;  %v1247_v7 = vld [vmem:[%s1134_s30 + $0x28] sm:$0xf] }
  0x30   : > { %257 = vst [vmem:[%s229_s5 + $0x8] sm:$0xf] %v1246_v6  ;;  %259 = vst [vmem:[%s229_s5 + $0xc] sm:$0xf] %v1247_v7 }
  0x31 PF: > { %290 = sbr.rel (!%p1685_p6) target bundleno = 59 (0x3b), region = 102  ;;  %s292_s7 = sand.u32 (%p1685_p6), 1, %s1547_s13  }
  0x32   : > { %s1138_s26 = smul.u32 (%p1685_p6), 12, %s1571_s19  ;;  %s1248_s10 = sshll.u32 (%p1685_p6), %s292_s7, 4 }
  0x33   : > { %s1139_s28 = smul.u32 (%p1685_p6), 24, %s1579_s21  ;;  %s294_s30 = scalar_lea.vmem (%p1685_p6), [#allocation7], %s1248_s10 }
  0x35   : > { %s1140_s29 = sadd.s32 (%p1685_p6), %s1139_s28, %s1138_s26 }
  0x36   : > { %s1249_s4 = sshll.u32 (%p1685_p6), %s1140_s29, 2 }
  0x37   : > { %s1142_s25 = scalar_lea.vmem (%p1685_p6), %s1986_s2, %s1249_s4 }
  0x38   : > { %v1250_v8 = vld [vmem:[%s1142_s25 + $0x8] sm:$0xf]  ;;  %v1251_v9 = vld [vmem:[%s1142_s25 + $0x14] sm:$0xf]  ;;  %v1252_v10 = vld [vmem:[%s1142_s25 + $0x20] sm:$0xf] }
  0x39   : > { %318 = vst [vmem:[%s294_s30] sm:$0xf] %v1250_v8  ;;  %320 = vst [vmem:[%s294_s30 + $0x4] sm:$0xf] %v1251_v9  ;;  %v1253_v11 = vld [vmem:[%s1142_s25 + $0x2c] sm:$0xf] }
  0x3a   : > { %322 = vst [vmem:[%s294_s30 + $0x8] sm:$0xf] %v1252_v10  ;;  %324 = vst [vmem:[%s294_s30 + $0xc] sm:$0xf] %v1253_v11 }
  0x3b PF: > { %p1254_p11 = scmp.ge.s32.totalorder %s1583_s22, 1  ;;  %p354_p12 = scmp.lt.s32.totalorder %s1583_s22, 9 }
  0x3d   : > { %p355_p13 = pnand %p1254_p11, %p354_p12 }
  0x3e   : > { %s361_s27 = sand.u32 (!%p355_p13), 1, %s1551_s14   ;;  %s368_s5 = sand.u32 (!%p355_p13), 1, %s1543_s12  }
  0x3f   : > { %358 = sbr.rel (%p355_p13) target bundleno = 1632 (0x660), region = 143  ;;  %s1734_s7 = sshll.u32 (!%p355_p13), %s361_s27, 4 }
  0x40   : > { %s1736_s26 = sshll.u32 (!%p355_p13), %s368_s5, 4  ;;  %s1258_s10 = sshll.u32 (!%p355_p13), %s1563_s17, 2 }
  0x41   : > { %p414_p0 = scmp.lt.s32.totalorder (!%p355_p13), %s1567_s18, 1  ;;  %p416_p1 = scmp.lt.s32.totalorder (!%p355_p13), %s1258_s10, 7 }
  0x42   : > { %s363_s12 = scalar_lea.vmem (!%p355_p13), [#allocation5], %s1734_s7  ;;  %s370_s25 = scalar_lea.vmem (!%p355_p13), [#allocation6], %s1736_s26 }
  0x43   : > { %s377_s30 = scalar_lea.vmem (!%p355_p13), [#allocation7], %s1736_s26  ;;  %p1261_p2 = scmp.ne.s32.totalorder (!%p355_p13), %s1559_s16, 0 }
  0x46   : > { %s2014_s18 = smov (!%p414_p0, %s1567_s18), 1  ;;  %s2016_s10 = smov (!%p416_p1, %s1258_s10), 7 }
  0x47   : > { %s1259_s28 = sshll.u32 %s2014_s18, 3  ;;  %427 = sbr.rel (%p1261_p2) target bundleno = 78 (0x4e), region = 159  ;;  %vm428_vm0 = vcmask (!%p1261_p2), 15360   ;;  %v1585_v12 = vmov (!%p1261_p2), -inf   ;;  %v1586_v13 = vmov (!%p1261_p2), 0.0  }
  0x48   : > { %s419_s29 = sadd.s32 %s1259_s28, %s2016_s10  ;;  %429 = vst.msk [vmem:[#allocation2] sm:$0xff] (!%p1261_p2), %vm428_vm0, %v1585_v12  ;;  %430 = vst.msk [vmem:[#allocation2 + $0x8] sm:$0xff] (!%p1261_p2), %vm428_vm0, %v1585_v12 }
  0x49   : > { %s1260_s4 = sshll.u32 %s419_s29, 2  ;;  %431 = vst.msk [vmem:[#allocation2 + $0x10] sm:$0xff] (!%p1261_p2), %vm428_vm0, %v1585_v12  ;;  %432 = vst.msk [vmem:[#allocation2 + $0x18] sm:$0xff] (!%p1261_p2), %vm428_vm0, %v1585_v12 }
  0x4a   : > { %s1744_s14 = scalar_lea.vmem %s1987_s3, %s1260_s4  ;;  %433 = vst.msk [vmem:[#allocation3] sm:$0xff] (!%p1261_p2), %vm428_vm0, %v1586_v13  ;;  %434 = vst.msk [vmem:[#allocation3 + $0x8] sm:$0xff] (!%p1261_p2), %vm428_vm0, %v1586_v13 }
  0x4b   : > { %435 = vst.msk [vmem:[#allocation3 + $0x10] sm:$0xff] (!%p1261_p2), %vm428_vm0, %v1586_v13  ;;  %436 = vst.msk [vmem:[#allocation3 + $0x18] sm:$0xff] (!%p1261_p2), %vm428_vm0, %v1586_v13 }
  0x4c   : > { %437 = vst [vmem:[#allocation4] sm:$0xff] (!%p1261_p2), %v1586_v13  ;;  %438 = vst [vmem:[#allocation4 + $0x8] sm:$0xff] (!%p1261_p2), %v1586_v13 }
  0x4d   : > { %439 = vst [vmem:[#allocation4 + $0x10] sm:$0xff] (!%p1261_p2), %v1586_v13  ;;  %440 = vst [vmem:[#allocation4 + $0x18] sm:$0xff] (!%p1261_p2), %v1586_v13 }
  0x4e PF: > { %v1455_v14 = vld [vmem:[%s370_s25] sm:$0xff]   ;;  %vm473_vm1 = vcmask 523264   ;;  %v1456_v15 = vld [vmem:[%s370_s25 + $0x8] sm:$0xff]   ;;  %vm539_vm2 = vcmask 261120   ;;  %v1587_v28 = vmov 0   ;;  %s1588_s17 = smov 64  }
  0x4f   : > { %1346 = vmatprep.subr.msk.bf16.mxu0 %vm473_vm1, %v1455_v14  ;;  %v481_v16 = vsel %vm473_vm1, %v1455_v14, 0  ;;  %v1457_v17 = vld [vmem:[%s363_s12] sm:$0xff]   ;;  %v484_v18 = vsel %vm473_vm1, %v1456_v15, 0  ;;  %v1458_v19 = vld [vmem:[%s363_s12 + $0x8] sm:$0xff]   ;;  %1448 = vset.pattern.permute.xlu1 %v1587_v28  ;;  %v1589_v11 = vmov 1   ;;  %vm989_vm3 = vcmask 7168  }
  0x50   : > { %1315 = vmatpush3.bf16.xpose.msra.mxu0 %v481_v16  ;;  %1318 = vmatprep.mubr.msk.bf16.mxu0 %vm473_vm1, %v1457_v17  ;;  %v1766_v29 = vld [vmem:[#allocation2 + $0x10] sm:$0xff]  ;;  %v1768_v30 = vld [vmem:[#allocation2] sm:$0xff]  ;;  %v1777_v35 = vld [vmem:[#allocation2 + $0x8] sm:$0xff]  ;;  %vm994_vm4 = vcmask 15360   ;;  %p1276_p3 = scmp.ne.s32.totalorder %s1559_s16, 1 }
  0x51   : > { %1347 = vmatprep.subr.msk.bf16.mxu0 %vm473_vm1, %v1456_v15  ;;  %1447 = vset.pattern.permute.xlu0 %v1587_v28  ;;  %v1783_v38 = vld [vmem:[#allocation2 + $0x18] sm:$0xff]  ;;  %v1792_v41 = vld [vmem:[%s377_s30] sm:$0xff]  }
  0x52   : > { %1322 = vmatprep.subr.bf16.mxu1 %v1792_v41  ;;  %v1799_v42 = vld [vmem:[%s377_s30 + $0x8] sm:$0xff]  }
  0x53   : > { %1323 = vmatpush3.bf16.msra.mxu1 %v1792_v41 }
  0x54   : > { %1324 = vmatprep.subr.bf16.mxu1 %v1799_v42 }
  0x57   : > { %1325 = vmatpush3.bf16.msra.mxu1 %v1799_v42 }
  0x58   : > { %1317 = vmatpush3.bf16.xpose.msra.mxu0 %v484_v18 }
  0x5f   : > { %1319 = vmatmul.mubr.msk.bf16.vlgmr.msra.gmra.mrb[0].mxu0 %vm473_vm1, %v1458_v19 }
 0x132   : > { %v1320_v20 = vpop.f32.mrb[0].mxu0 }
 0x133   : > { %v520_v21 = vpop.f32.mrb[1].mxu0  ;;  %v546_v22 = vsel %vm539_vm2, %v1320_v20, -inf }
 0x134   : > { %547 = vmax.xlane.f32.xlu1 %v546_v22  ;;  %v1321_v23 = vpop.f32.mrb[2].mxu0  ;;  %v540_v24 = vsel %vm539_vm2, %v520_v21, -inf }
 0x135   : > { %541 = vmax.xlane.f32.xlu0 %v540_v24  ;;  %v523_v25 = vpop.f32.mrb[3].mxu0  ;;  %v549_v26 = vsel %vm539_vm2, %v1321_v23, -inf }
 0x136   : > { %v543_v27 = vsel %vm539_vm2, %v523_v25, -inf }
 0x138   : > { %550 = vmax.xlane.f32.xlu1 %v549_v26 }
 0x139   : > { %544 = vmax.xlane.f32.xlu0 %v543_v27 }
 0x1c1   : > { %v548_v31 = vpop.xlane.xlu1 %547 }
 0x1c2   : > { %v1771_v32 = vmax.f32 %v1766_v29, %v548_v31  ;;  %v542_v33 = vpop.xlane.xlu0 %541 }
 0x1c3   : > { %v1774_v34 = vmax.f32 %v1768_v30, %v542_v33 }
 0x1c4   : > { %580 = vperm.xlu1 %1448, %v1771_v32  }
 0x1c5   : > { %570 = vperm.xlu0 %1447, %v1774_v34   ;;  %v551_v39 = vpop.xlane.xlu1 %550 }
 0x1c6   : > { %v545_v36 = vpop.xlane.xlu0 %544  ;;  %v1787_v40 = vmax.f32 %v1783_v38, %v551_v39 }
 0x1c7   : > { %v1781_v37 = vmax.f32 %v1777_v35, %v545_v36 }
 0x1c9   : > { %575 = vperm.xlu1 %1448, %v1781_v37   ;;  %1449 = vset.pattern.permute.xlu0 %v1589_v11 }
 0x1cd   : > { %585 = vperm.xlu1 %1448, %v1787_v40  }
 0x1d1   : > { %719 = vrot.lane.b32.xlu1 %v1455_v14, %s1588_s17 }
 0x1d2   : > { %1450 = vset.pattern.permute.xlu1 %v1589_v11 }
 0x1d5   : > { %721 = vrot.lane.b32.xlu1 %v1456_v15, %s1588_s17 }
 0x1d9   : > { %715 = vrot.lane.b32.xlu1 %v1457_v17, %s1588_s17 }
 0x1dd   : > { %717 = vrot.lane.b32.xlu1 %v1458_v19, %s1588_s17 }
 0x243   : > { %v581_v43 = vpop.permute.xlu1 %580 }
 0x244   : > { %v571_v44 = vpop.permute.xlu0 %570  ;;  %v590_v50 = vsub.f32 %v1320_v20, %v581_v43  ;;  %v559_v43 = vsub.f32 %v1783_v38, %v1787_v40 }
 0x245   : > { %v588_v46 = vsub.f32 %v520_v21, %v571_v44 }
 0x248   : > { %v576_v45 = vpop.permute.xlu1 %575 }
 0x249   : > { %v589_v47 = vsub.f32 %v523_v25, %v576_v45  ;;  %v566_v45 = vmul.f32 1.442695, %v559_v43  ;;  %v600_v43 = vld [vmem:[#allocation3] sm:$0xff] }
 0x24b   : > { %v592_v48 = vpack.c.bf16 %v589_v47, %v588_v46 }
 0x24c   : > { %v586_v49 = vpop.permute.xlu1 %585 }
 0x24d   : > { %v595_v51 = vmul.bf16 1069105081, %v592_v48  ;;  %v591_v52 = vsub.f32 %v1321_v23, %v586_v49 }
 0x24f   : > { %1461 = vpow.bf16 %v595_v51  ;;  %v593_v53 = vpack.c.bf16 %v591_v52, %v590_v50 }
 0x250   : > { %v720_v54 = vpop.permute.xlu1 %719 }
 0x251   : > { %v598_v55 = vmul.bf16 1069105081, %v593_v53  ;;  %1348 = vmatprep.subr.msk.bf16.mxu1 %vm473_vm1, %v720_v54  ;;  %v730_v58 = vsel %vm473_vm1, %v720_v54, 0 }
 0x253   : > { %1463 = vpow.bf16 %v598_v55 }
 0x254   : > { %v722_v56 = vpop.permute.xlu1 %721 }
 0x255   : > { %v733_v61 = vsel %vm473_vm1, %v722_v56, 0 }
 0x258   : > { %v716_v59 = vpop.permute.xlu1 %715 }
 0x25a   : > { %v1807_v57 = vpop.eup %1461 }
 0x25b   : > { %1326 = vmatprep.mubr.msk.bf16.mxu1 %vm539_vm2, %v1807_v57  ;;  %v609_v24 = vunpack.c.h.bf16 %v1807_v57  ;;  %v608_v31 = vunpack.c.l.bf16 %v1807_v57 }
 0x25c   : > { %v718_v62 = vpop.permute.xlu1 %717 }
 0x25d   : > { %v615_v25 = vsel %vm539_vm2, %v609_v24, 0.0  ;;  %v612_v33 = vsel %vm539_vm2, %v608_v31, 0.0 }
 0x25e   : > { %v1812_v60 = vpop.eup %1463 }
 0x25f   : > { %1327 = vmatmul.mubr.msk.bf16.vlgmr.msra.gmra.mrb[0].mxu1 %vm539_vm2, %v1812_v60  ;;  %v611_v26 = vunpack.c.h.bf16 %v1812_v60  ;;  %v610_v36 = vunpack.c.l.bf16 %v1812_v60 }
 0x260   : > { %1331 = vmatpush3.bf16.xpose.msra.mxu1 %v730_v58  ;;  %1334 = vmatprep.mubr.msk.bf16.mxu1 %vm473_vm1, %v716_v59 }
 0x261   : > { %1349 = vmatprep.subr.msk.bf16.mxu1 %vm473_vm1, %v722_v56  ;;  %v621_v27 = vsel %vm539_vm2, %v611_v26, 0.0  ;;  %v618_v39 = vsel %vm539_vm2, %v610_v36, 0.0  ;;  %v602_v26 = vld [vmem:[#allocation3 + $0x10] sm:$0xff]  ;;  %v603_v36 = vld [vmem:[#allocation3 + $0x18] sm:$0xff] }
 0x268   : > { %1333 = vmatpush3.bf16.xpose.msra.mxu1 %v733_v61 }
 0x26f   : > { %1335 = vmatmul.mubr.msk.bf16.vlgmr.msra.gmra.mrb[4].mxu1 %vm473_vm1, %v718_v62 }
 0x332   : > { %v1820_v63 = vpop.f32.mrb[0].mxu1 }
 0x333   : > { %v1822_v0 = vpop.f32.mrb[1].mxu1 }
 0x334   : > { %v1824_v1 = vpop.f32.mrb[2].mxu1 }
 0x335   : > { %v1826_v2 = vpop.f32.mrb[3].mxu1 }
 0x342   : > { %v1828_v3 = vpop.f32.mrb[4].mxu1 }
 0x343   : > { %v1830_v4 = vpop.f32.mrb[5].mxu1  ;;  %v790_v10 = vsel %vm539_vm2, %v1828_v3, -inf }
 0x344   : > { %v1832_v5 = vpop.f32.mrb[6].mxu1  ;;  %v784_v6 = vsel %vm539_vm2, %v1830_v4, -inf }
 0x345   : > { %785 = vmax.xlane.f32.xlu1 %v784_v6  ;;  %v1836_v7 = vpop.f32.mrb[7].mxu1  ;;  %v793_v9 = vsel %vm539_vm2, %v1832_v5, -inf }
 0x346   : > { %v787_v8 = vsel %vm539_vm2, %v1836_v7, -inf }
 0x347   : > { %788 = vmax.xlane.f32.xlu0 %v787_v8 }
 0x349   : > { %794 = vmax.xlane.f32.xlu1 %v793_v9 }
 0x34b   : > { %791 = vmax.xlane.f32.xlu0 %v790_v10 }
 0x3d2   : > { %v786_v12 = vpop.xlane.xlu1 %785 }
 0x3d3   : > { %v796_v13 = vmax.f32 %v1768_v30, %v786_v12 }
 0x3d4   : > { %v789_v14 = vpop.xlane.xlu0 %788 }
 0x3d5   : > { %v990_v15 = vsel %vm989_vm3, %v1774_v34, %v796_v13  ;;  %v797_v16 = vmax.f32 %v1777_v35, %v789_v14  ;;  %814 = vperm.xlu0 %1449, %v796_v13   ;;  %v800_v46 = vsub.f32 %v1768_v30, %v796_v13 }
 0x3d6   : > { %995 = vst.msk [vmem:[#allocation2] sm:$0xff] %vm994_vm4, %v990_v15  ;;  %v795_v17 = vpop.xlane.xlu1 %794 }
 0x3d7   : > { %v991_v18 = vsel %vm989_vm3, %v1781_v37, %v797_v16  ;;  %v799_v19 = vmax.f32 %v1783_v38, %v795_v17  ;;  %v804_v47 = vmul.f32 1.442695, %v800_v46 }
 0x3d8   : > { %996 = vst.msk [vmem:[#allocation2 + $0x8] sm:$0xff] %vm994_vm4, %v991_v18  ;;  %v792_v20 = vpop.xlane.xlu0 %791 }
 0x3d9   : > { %v993_v21 = vsel %vm989_vm3, %v1787_v40, %v799_v19  ;;  %1452 = vset.pattern.permute.xlu0 %v1587_v28  ;;  %v798_v22 = vmax.f32 %v1766_v29, %v792_v20  ;;  %v803_v40 = vsub.f32 %v1783_v38, %v799_v19  ;;  %v558_v20 = vsub.f32 %v1766_v29, %v1771_v32 }
 0x3da   : > { %998 = vst.msk [vmem:[#allocation2 + $0x18] sm:$0xff] %vm994_vm4, %v993_v21 }
 0x3db   : > { %v992_v23 = vsel %vm989_vm3, %v1771_v32, %v798_v22  ;;  %824 = vperm.xlu1 %1450, %v798_v22   ;;  %v564_v21 = vmul.f32 1.442695, %v558_v20 }
 0x3dc   : > { %997 = vst.msk [vmem:[#allocation2 + $0x10] sm:$0xff] %vm994_vm4, %v992_v23 }
 0x3df   : > { %819 = vperm.xlu1 %1450, %v797_v16  }
 0x3e3   : > { %829 = vperm.xlu1 %1450, %v799_v19  }
 0x3e7   : > { %868 = vrot.lane.b32.xlu1 %v1792_v41, %s1588_s17 }
 0x3e8   : > { %1451 = vset.pattern.permute.xlu1 %v1587_v28  ;;  %v556_v28 = vsub.f32 %v1768_v30, %v1774_v34  ;;  %v801_v34 = vsub.f32 %v1777_v35, %v797_v16 }
 0x3ea   : > { %v560_v41 = vmul.f32 1.442695, %v556_v28  ;;  %v806_v49 = vmul.f32 1.442695, %v801_v34 }
 0x3eb   : > { %870 = vrot.lane.b32.xlu1 %v1799_v42, %s1588_s17  ;;  %v557_v42 = vsub.f32 %v1777_v35, %v1781_v37  ;;  %v802_v37 = vsub.f32 %v1766_v29, %v798_v22  ;;  %v810_v35 = vmul.f32 1.442695, %v803_v40 }
 0x3ec   : > { %1465 = vpow2.f32 %v560_v41 }
 0x3ed   : > { %v562_v44 = vmul.f32 1.442695, %v557_v42  ;;  %v808_v30 = vmul.f32 1.442695, %v802_v37 }
 0x3ef   : > { %1467 = vpow2.f32 %v562_v44 }
 0x3f0   : > { %1469 = vpow2.f32 %v566_v45 }
 0x3f1   : > { %1471 = vpow2.f32 %v804_v47 }
 0x3f2   : > { %1473 = vpow2.f32 %v806_v49  ;;  %v601_v49 = vld [vmem:[#allocation3 + $0x8] sm:$0xff] }
 0x3f3   : > { %1475 = vpow2.f32 %v808_v30 }
 0x3f4   : > { %616 = vadd.xlane.f32.xlu0 %v615_v25  ;;  %1477 = vpow2.f32 %v810_v35 }
 0x3f6   : > { %v1884_v48 = vpop.eup %1465 }
 0x3f7   : > { %v604_v46 = vmul.f32 %v1884_v48, %v600_v43 }
 0x3f8   : > { %622 = vadd.xlane.f32.xlu0 %v621_v27 }
 0x3f9   : > { %v1888_v50 = vpop.eup %1467 }
 0x3fa   : > { %v1892_v51 = vpop.eup %1469 }
 0x3fb   : > { %v1895_v52 = vpop.eup %1471  ;;  %v607_v42 = vmul.f32 %v1892_v51, %v603_v36 }
 0x3fc   : > { %v1899_v53 = vpop.eup %1473  ;;  %v844_v34 = vmul.f32 %v1895_v52, %v600_v43 }
 0x3fd   : > { %v1476_v54 = vpop.eup %1475 }
 0x3fe   : > { %v1478_v38 = vpop.eup %1477 }
 0x3ff   : > { %v847_v32 = vmul.f32 %v1478_v38, %v603_v36 }
 0x40f   : > { %613 = vadd.xlane.f32.xlu1 %v612_v33  ;;  %v846_v33 = vmul.f32 %v1476_v54, %v602_v26 }
 0x413   : > { %619 = vadd.xlane.f32.xlu1 %v618_v39 }
 0x424   : > { %697 = vperm.xlu1 %1451, %v1884_v48  }
 0x428   : > { %702 = vperm.xlu1 %1451, %v1888_v50  }
 0x42c   : > { %712 = vperm.xlu1 %1451, %v1892_v51   ;;  %v605_v51 = vmul.f32 %v1888_v50, %v601_v49 }
 0x430   : > { %1453 = vset.pattern.permute.xlu1 %v1589_v11 }
 0x431   : > { %931 = vperm.xlu1 %1453, %v1895_v52  }
 0x435   : > { %936 = vperm.xlu1 %1453, %v1899_v53  }
 0x439   : > { %941 = vperm.xlu1 %1453, %v1476_v54   ;;  %v845_v54 = vmul.f32 %v1899_v53, %v601_v49 }
 0x43d   : > { %946 = vperm.xlu1 %1453, %v1478_v38  }
 0x454   : > { %v815_v56 = vpop.permute.xlu0 %814 }
 0x455   : > { %v832_v58 = vsub.f32 %v1830_v4, %v815_v56 }
 0x45a   : > { %v825_v55 = vpop.permute.xlu1 %824 }
 0x45b   : > { %v834_v62 = vsub.f32 %v1828_v3, %v825_v55 }
 0x45e   : > { %v820_v57 = vpop.permute.xlu1 %819 }
 0x45f   : > { %v833_v59 = vsub.f32 %v1836_v7, %v820_v57 }
 0x461   : > { %v836_v60 = vpack.c.bf16 %v833_v59, %v832_v58 }
 0x462   : > { %v830_v61 = vpop.permute.xlu1 %829 }
 0x463   : > { %v839_v6 = vmul.bf16 1069105081, %v836_v60  ;;  %v835_v8 = vsub.f32 %v1832_v5, %v830_v61 }
 0x465   : > { %1479 = vpow.bf16 %v839_v6  ;;  %v837_v9 = vpack.c.bf16 %v835_v8, %v834_v62 }
 0x466   : > { %v869_v10 = vpop.permute.xlu1 %868 }
 0x467   : > { %v842_v12 = vmul.bf16 1069105081, %v837_v9  ;;  %1338 = vmatprep.subr.bf16.mxu0 %v869_v10 }
 0x468   : > { %1339 = vmatpush3.bf16.msra.mxu0 %v869_v10  ;;  %v955_v10 = vld [vmem:[#allocation4 + $0x10] sm:$0xff] }
 0x469   : > { %1481 = vpow.bf16 %v842_v12 }
 0x46a   : > { %v871_v13 = vpop.permute.xlu1 %870  ;;  %1483 = vpow2.f32 %v564_v21 }
 0x46b   : > { %1340 = vmatprep.subr.bf16.mxu0 %v871_v13 }
 0x46c   : > { %1341 = vmatpush3.bf16.msra.mxu0 %v871_v13 }
 0x470   : > { %v1480_v4 = vpop.eup %1479 }
 0x471   : > { %1342 = vmatprep.mubr.msk.bf16.mxu0 %vm539_vm2, %v1480_v4  ;;  %v848_v16 = vunpack.c.l.bf16 %v1480_v4  ;;  %v849_v18 = vunpack.c.h.bf16 %v1480_v4 }
 0x473   : > { %v852_v17 = vsel %vm539_vm2, %v848_v16, 0.0  ;;  %v855_v19 = vsel %vm539_vm2, %v849_v18, 0.0 }
 0x474   : > { %v1482_v7 = vpop.eup %1481 }
 0x475   : > { %1343 = vmatmul.mubr.msk.bf16.vlgmr.msra.gmra.mrb[4].mxu0 %vm539_vm2, %v1482_v7  ;;  %v850_v3 = vunpack.c.l.bf16 %v1482_v7  ;;  %v851_v5 = vunpack.c.h.bf16 %v1482_v7  ;;  %v1484_v22 = vpop.eup %1483  ;;  %v953_v7 = vld [vmem:[#allocation4] sm:$0xff] }
 0x476   : > { %v606_v31 = vmul.f32 %v1484_v22, %v602_v26 }
 0x477   : > { %v858_v14 = vsel %vm539_vm2, %v850_v3, 0.0  ;;  %v861_v15 = vsel %vm539_vm2, %v851_v5, 0.0 }
 0x478   : > { %859 = vadd.xlane.f32.xlu0 %v858_v14 }
 0x47c   : > { %862 = vadd.xlane.f32.xlu0 %v861_v15 }
 0x480   : > { %853 = vadd.xlane.f32.xlu0 %v852_v17  ;;  %v954_v17 = vld [vmem:[#allocation4 + $0x8] sm:$0xff] }
 0x481   : > { %v617_v23 = vpop.xlane.xlu0 %616 }
 0x482   : > { %v625_v48 = vadd.f32 %v617_v23, %v605_v51  ;;  %v956_v23 = vld [vmem:[#allocation4 + $0x18] sm:$0xff] }
 0x484   : > { %856 = vadd.xlane.f32.xlu0 %v855_v19 }
 0x485   : > { %v623_v25 = vpop.xlane.xlu0 %622 }
 0x486   : > { %v627_v44 = vadd.f32 %v623_v25, %v607_v42 }
 0x49a   : > { %707 = vperm.xlu0 %1452, %v1484_v22  }
 0x49c   : > { %v614_v24 = vpop.xlane.xlu1 %613 }
 0x49d   : > { %v624_v40 = vadd.f32 %v614_v24, %v604_v46 }
 0x49e   : > { %1454 = vset.pattern.permute.xlu0 %v1589_v11 }
 0x4a0   : > { %v620_v27 = vpop.xlane.xlu1 %619 }
 0x4a1   : > { %v626_v39 = vadd.f32 %v620_v27, %v606_v31 }
 0x4a4   : > { %v698_v50 = vpop.permute.xlu1 %697 }
 0x4a8   : > { %v703_v53 = vpop.permute.xlu1 %702 }
 0x4ac   : > { %v713_v60 = vpop.permute.xlu1 %712 }
 0x4b0   : > { %v932_v61 = vpop.permute.xlu1 %931 }
 0x4b1   : > { %v949_v3 = vsel %vm473_vm1, %v698_v50, %v932_v61 }
 0x4b2   : > { %v957_v15 = vmul.f32 %v953_v7, %v949_v3 }
 0x4b4   : > { %v937_v62 = vpop.permute.xlu1 %936 }
 0x4b5   : > { %v950_v18 = vsel %vm473_vm1, %v703_v53, %v937_v62 }
 0x4b6   : > { %v958_v21 = vmul.f32 %v954_v17, %v950_v18 }
 0x4b8   : > { %v942_v6 = vpop.permute.xlu1 %941 }
 0x4bc   : > { %v947_v9 = vpop.permute.xlu1 %946 }
 0x4bd   : > { %v952_v24 = vsel %vm473_vm1, %v713_v60, %v947_v9 }
 0x4be   : > { %v960_v26 = vmul.f32 %v956_v23, %v952_v24 }
 0x505   : > { %v860_v28 = vpop.xlane.xlu0 %859 }
 0x506   : > { %v866_v41 = vadd.f32 %v860_v28, %v846_v33 }
 0x508   : > { %v1001_v29 = vsel %vm989_vm3, %v626_v39, %v866_v41  ;;  %v1590_v39 = vmov (!%p1276_p3), 0  }
 0x509   : > { %1005 = vst.msk [vmem:[#allocation3 + $0x10] sm:$0xff] %vm994_vm4, %v1001_v29  ;;  %v863_v11 = vpop.xlane.xlu0 %862  ;;  %1486 = vset.pattern.permute.xlu1 (!%p1276_p3), %v1590_v39  ;;  %1485 = vset.pattern.permute.xlu0 (!%p1276_p3), %v1590_v39 }
 0x50a   : > { %v867_v45 = vadd.f32 %v863_v11, %v847_v32  ;;  %v1591_v32 = vmov (!%p1276_p3), 1  }
 0x50c   : > { %v1002_v47 = vsel %vm989_vm3, %v627_v44, %v867_v45 }
 0x50d   : > { %1006 = vst.msk [vmem:[#allocation3 + $0x18] sm:$0xff] %vm994_vm4, %v1002_v47  ;;  %v854_v37 = vpop.xlane.xlu0 %853 }
 0x50e   : > { %v864_v30 = vadd.f32 %v854_v37, %v844_v34 }
 0x510   : > { %v999_v35 = vsel %vm989_vm3, %v624_v40, %v864_v30 }
 0x511   : > { %1003 = vst.msk [vmem:[#allocation3] sm:$0xff] %vm994_vm4, %v999_v35  ;;  %v857_v38 = vpop.xlane.xlu0 %856 }
 0x512   : > { %v865_v55 = vadd.f32 %v857_v38, %v845_v54 }
 0x514   : > { %v1000_v56 = vsel %vm989_vm3, %v625_v48, %v865_v55  ;;  %v1014_v28 = vld [vmem:[#allocation3 + $0x18] sm:$0xff] (!%p1276_p3) }
 0x515   : > { %1004 = vst.msk [vmem:[#allocation3 + $0x8] sm:$0xff] %vm994_vm4, %v1000_v56 }
 0x518   : > { %v1011_v36 = vld [vmem:[#allocation3] sm:$0xff] (!%p1276_p3) }
 0x519   : > { %v708_v8 = vpop.permute.xlu0 %707 }
 0x51a   : > { %v951_v12 = vsel %vm473_vm1, %v708_v8, %v942_v6 }
 0x51b   : > { %v959_v13 = vmul.f32 %v955_v10, %v951_v12 }
 0x548   : > { %v1344_v52 = vpop.f32.mrb[4].mxu0 }
 0x549   : > { %v914_v57 = vpop.f32.mrb[5].mxu0  ;;  %969 = vrot.lane.b32.xlu1 %v1344_v52, %s1588_s17 }
 0x54a   : > { %v1345_v58 = vpop.f32.mrb[6].mxu0 }
 0x54b   : > { %v917_v59 = vpop.f32.mrb[7].mxu0 }
 0x54d   : > { %965 = vrot.lane.b32.xlu1 %v914_v57, %s1588_s17 }
 0x551   : > { %967 = vrot.lane.b32.xlu1 %v917_v59, %s1588_s17 }
 0x555   : > { %971 = vrot.lane.b32.xlu1 %v1345_v58, %s1588_s17 }
 0x5bb   : > { %v970_v4 = vpop.permute.xlu1 %969 }
 0x5bc   : > { %v979_v14 = vsel %vm473_vm1, %v1820_v63, %v970_v4 }
 0x5bd   : > { %v983_v5 = vadd.f32 %v979_v14, %v959_v13 }
 0x5bf   : > { %987 = vst [vmem:[#allocation4 + $0x10] sm:$0xff] %v983_v5  ;;  %v966_v16 = vpop.permute.xlu1 %965 }
 0x5c0   : > { %v977_v19 = vsel %vm473_vm1, %v1822_v0, %v966_v16  ;;  %v1013_v0 = vld [vmem:[#allocation3 + $0x10] sm:$0xff] (!%p1276_p3) }
 0x5c1   : > { %v981_v20 = vadd.f32 %v977_v19, %v957_v15  ;;  %1489 = vrcp.f32 (!%p1276_p3), %v1013_v0 }
 0x5c2   : > { %1491 = vrcp.f32 (!%p1276_p3), %v1011_v36 }
 0x5c3   : > { %985 = vst [vmem:[#allocation4] sm:$0xff] %v981_v20  ;;  %v968_v22 = vpop.permute.xlu1 %967  ;;  %1493 = vrcp.f32 (!%p1276_p3), %v1014_v28 }
 0x5c4   : > { %v978_v63 = vsel %vm473_vm1, %v1826_v2, %v968_v22  ;;  %v1012_v2 = vld [vmem:[#allocation3 + $0x8] sm:$0xff] (!%p1276_p3) }
 0x5c5   : > { %v982_v25 = vadd.f32 %v978_v63, %v958_v21  ;;  %1010 = sbr.rel (%p1276_p3) target bundleno = 1632 (0x660), region = 163  ;;  %1495 = vrcp.f32 (!%p1276_p3), %v1012_v2 }
 0x5c6   : > { %v1021_v30 = vld [vmem:[#allocation4 + $0x10] sm:$0xff] (!%p1276_p3) }
 0x5c7   : > { %986 = vst [vmem:[#allocation4 + $0x8] sm:$0xff] %v982_v25  ;;  %v972_v27 = vpop.permute.xlu1 %971 }
 0x5c8   : > { %v980_v31 = vsel %vm473_vm1, %v1824_v1, %v972_v27 }
 0x5c9   : > { %v984_v33 = vadd.f32 %v980_v31, %v960_v26 }
 0x5ca   : > { %v1019_v47 = vld [vmem:[#allocation4] sm:$0xff] (!%p1276_p3) }
 0x5cb   : > { %988 = vst [vmem:[#allocation4 + $0x18] sm:$0xff] %v984_v33  ;;  %v1490_v41 = vpop.eup (!%p1276_p3), %1489 }
 0x5cc   : > { %v1492_v42 = vpop.eup %1491  ;;  %1035 = vperm.xlu1 %1486, %v1490_v41  }
 0x5cd   : > { %v1494_v1 = vpop.eup %1493  ;;  %1025 = vperm.xlu0 %1485, %v1492_v42  }
 0x5ce   : > { %v1020_v46 = vld [vmem:[#allocation4 + $0x8] sm:$0xff] }
 0x5cf   : > { %v1496_v29 = vpop.eup %1495 }
 0x5d0   : > { %1040 = vperm.xlu1 %1486, %v1494_v1  }
 0x5d1   : > { %1030 = vperm.xlu0 %1485, %v1496_v29  }
 0x5d2   : > { %v1022_v54 = vld [vmem:[#allocation4 + $0x18] sm:$0xff] }
 0x5d4   : > { %1488 = vset.pattern.permute.xlu1 %v1591_v32 }
 0x5d5   : > { %1487 = vset.pattern.permute.xlu0 %v1591_v32  ;;  %1052 = vperm.xlu1 %1488, %v1496_v29  }
 0x5d6   : > { %1048 = vperm.xlu0 %1487, %v1492_v42  }
 0x5d9   : > { %1056 = vperm.xlu1 %1488, %v1490_v41  }
 0x5da   : > { %1060 = vperm.xlu0 %1487, %v1494_v1  }
 0x64b   : > { %v1036_v43 = vpop.permute.xlu1 %1035 }
 0x64c   : > { %v1026_v11 = vpop.permute.xlu0 %1025  ;;  %v1045_v56 = vmul.f32 %v1036_v43, %v1021_v30 }
 0x64d   : > { %v1043_v51 = vmul.f32 %v1026_v11, %v1019_v47 }
 0x64f   : > { %v1041_v44 = vpop.permute.xlu1 %1040 }
 0x650   : > { %v1031_v45 = vpop.permute.xlu0 %1030  ;;  %v1046_v59 = vmul.f32 %v1041_v44, %v1022_v54 }
 0x651   : > { %v1044_v49 = vmul.f32 %v1031_v45, %v1020_v46 }
 0x654   : > { %v1053_v34 = vpop.permute.xlu1 %1052 }
 0x655   : > { %v1064_v37 = vmul.f32 %v1053_v34, %v1020_v46  ;;  %v1049_v40 = vpop.permute.xlu0 %1048 }
 0x656   : > { %v1063_v35 = vmul.f32 %v1049_v40, %v1019_v47 }
 0x657   : > { %v1068_v38 = vsel %vm473_vm1, %v1044_v49, %v1064_v37 }
 0x658   : > { %v1067_v48 = vsel %vm473_vm1, %v1043_v51, %v1063_v35  ;;  %v1057_v55 = vpop.permute.xlu1 %1056 }
 0x659   : > { %v1290_v52 = vpack.c.bf16 %v1068_v38, %v1067_v48  ;;  %v1065_v57 = vmul.f32 %v1057_v55, %v1021_v30  ;;  %v1061_v58 = vpop.permute.xlu0 %1060 }
 0x65a   : > { %v1066_v50 = vmul.f32 %v1061_v58, %v1022_v54 }
 0x65b   : > { %1291 = vst [vmem:[%s1744_s14] sm:$0xff] %v1290_v52   ;;  %v1069_v53 = vsel %vm473_vm1, %v1045_v56, %v1065_v57 }
 0x65c   : > { %v1070_v60 = vsel %vm473_vm1, %v1046_v59, %v1066_v50 }
 0x65d   : > { %v1295_v61 = vpack.c.bf16 %v1070_v60, %v1069_v53 }
 0x65f   : > { %1297 = vst [vmem:[%s1744_s14 + $0x8] sm:$0xff] %v1295_v61  }
 0x660 PF: > { %s13_s22 = sadd.s32 1, %s1583_s22   ;;  %s1992_s27 = sld [smem:[#allocation8_spill]] }
 0x661   : > { %p10_p4 = scmp.ge.s32.totalorder %s13_s22, 10   ;;  %s1993_s12 = smov %s1547_s13 }
 0x662   : > { %s1994_s13 = smov %s1703_s9  ;;  %s1995_s14 = smov %s1555_s15 }
 0x663   : > { %s1996_s15 = smov %s1700_s8  ;;  %s1997_s16 = smov %s1571_s19 }
 0x664   : > { %s1998_s17 = smov %s1575_s20  ;;  %s1999_s18 = smov %s1579_s21 }
 0x665   : > { %s2000_s19 = smov %s2004_s23  ;;  %s2001_s20 = smov %s2008_s24 }
 0x666   : > { %s2002_s21 = smov %s1992_s27  ;;  %12 = sbr.rel (!%p10_p4) target bundleno = 6 (0x6), region = 214 }

// kernel: self_attention_forward.3
= control target key start
LH: loop header
LB: loop body
LE: loop exit
PB: predicated region body
PF: predicated region fallthrough
CT: control target
= control target key end

     0   :  { %8 = vsyncpa [#allocation4], 0  ;;  %s1382_s0 = inlined_call_operand.hbm [shape: f32[128,128], index: 0, kind: input, shape index: {}]   ;;  %s1383_s1 = inlined_call_operand.hbm [shape: bf16[128,384], index: 1, kind: input, shape index: {}]   ;;  %s1384_s2 = inlined_call_operand.vmem [shape: f32[1,384], index: 2, kind: input, shape index: {}]   ;;  %s1385_s3 = inlined_call_operand.vmem [shape: bf16[128,384], index: 3, kind: output, shape index: {}]  }
   0x1   :  { %9 = vsyncpa [#allocation6], 0  ;;  %s1170_s12 = smov [#allocation3]   ;;  %s1122_s16 = scalar_lea.hbm %s1382_s0, 2048 }
   0x2   :  { %s15_s13 = sshll.u32 %s1170_s12, 4  ;;  %p1123_p0 = scmp.ne.s32.totalorder %s1382_s0, %s1122_s16  ;;  %s16_s13 = int_to_ptr.vmem [resolvable:$true] %s15_s13 }
   0x3   :  { %p1126_p1 = scmp.lt.u32.totalorder %s1122_s16, %s1382_s0 }
   0x5   :  { %p1128_p2 = pnand %p1126_p1, %p1123_p0 }
   0x7   :  { %1131 = shalt.err (!%p1128_p2)
}
   0x8   :  { %s1132_s21 = scalar_lea.vmem %s16_s13, 2048  ;;  %p1137_p4 = scmp.lt.s32.totalorder %s16_s13, %s16_s13 }
   0x9   :  { %p1133_p3 = scmp.ne.s32.totalorder %s16_s13, %s1132_s21  ;;  %p1138_p5 = scmp.lt.s32.totalorder %s1132_s21, %s1132_s21 }
   0xb   :  { %p1139_p6 = por %p1138_p5, %p1137_p4 }
   0xd   :  { %p1140_p7 = pnand %p1139_p6, %p1133_p3 }
   0xf   :  { %1143 = shalt.err (!%p1140_p7)
}
  0x10   :  { %s1171_s22 = smov 128   ;;  %s1172_s23 = smov 8  }
  0x11   :  { %21 = dma.hbm_to_vmem [thread:$0]  %s1382_s0, 2048, %s16_s13, [#allocation4], %s1171_s22, %s1171_s22, %s1172_s23  }
  0x12   :  { %s1173_s26 = smov [#allocation5]   ;;  %s1144_s30 = scalar_lea.hbm %s1383_s1, 3072 }
  0x13   :  { %s27_s27 = sshll.u32 %s1173_s26, 4  ;;  %p1145_p8 = scmp.ne.s32.totalorder %s1383_s1, %s1144_s30  ;;  %s28_s27 = int_to_ptr.vmem [resolvable:$true] %s27_s27 }
  0x14   :  { %p1148_p9 = scmp.lt.u32.totalorder %s1144_s30, %s1383_s1 }
  0x16   :  { %p1150_p10 = pnand %p1148_p9, %p1145_p8 }
  0x18   :  { %1153 = shalt.err (!%p1150_p10)
}
  0x19   :  { %s1154_s8 = scalar_lea.vmem %s28_s27, 3072  ;;  %p1159_p12 = scmp.lt.s32.totalorder %s28_s27, %s28_s27 }
  0x1a   :  { %p1155_p11 = scmp.ne.s32.totalorder %s28_s27, %s1154_s8  ;;  %p1160_p13 = scmp.lt.s32.totalorder %s1154_s8, %s1154_s8 }
  0x1c   :  { %p1161_p0 = por %p1160_p13, %p1159_p12 }
  0x1e   :  { %p1162_p1 = pnand %p1161_p0, %p1155_p11 }
  0x20   :  { %1165 = shalt.err (!%p1162_p1)
}
  0x21   :  { %s1174_s0 = smov 192   ;;  %s1175_s9 = smov 12  }
  0x22   :  { %33 = dma.hbm_to_vmem [thread:$0]  %s1383_s1, 3072, %s28_s27, [#allocation6], %s1174_s0, %s1174_s0, %s1175_s9  }
  0x23   :  { %1166 = dma.done.wait [#allocation4], 2048  }
  0x24   :  { %1167 = vsyncadd [#allocation4], 4294965248 }
  0x25   :  { %1168 = dma.done.wait [#allocation6], 3072  }
  0x26   :  { %1169 = vsyncadd [#allocation6], 4294964224  ;;  %v1176_v0 = vmov 0   ;;  %v1090_v1 = vld [vmem:[#allocation5 + $0x4] ss:$12 sps:$4 sm:$0xff]   ;;  %v144_v12 = vld [vmem:[#allocation3 + $0x8] sm:$0xff]  ;;  %v686_v49 = vlaneseq }
  0x27   :  { %359 = vmatprep.mubr.bf16.mxu0 %v1176_v0  ;;  %v1092_v2 = vld [vmem:[#allocation5] ss:$12 sps:$4 sm:$0xff]   ;;  %327 = vmatprep.subr.bf16.mxu0 %v1090_v1  ;;  %v1093_v3 = vld [vmem:[#allocation5 + $0x1c] ss:$12 sps:$4 sm:$0xff]   ;;  %v1095_v4 = vld [vmem:[#allocation5 + $0x18] ss:$12 sps:$4 sm:$0xff]  }
  0x28   :  { %328 = vmatpush1.bf16.msra.mxu0 %v1092_v2  ;;  %v1096_v5 = vld [vmem:[#allocation5 + $0x34] ss:$12 sps:$4 sm:$0xff]   ;;  %v1098_v6 = vld [vmem:[#allocation5 + $0x30] ss:$12 sps:$4 sm:$0xff]   ;;  %v1099_v7 = vld [vmem:[#allocation5 + $0x4c] ss:$12 sps:$4 sm:$0xff]  }
  0x29   :  { %329 = vmatprep.subr.bf16.mxu0 %v1093_v3  ;;  %v1101_v8 = vld [vmem:[#allocation5 + $0x48] ss:$12 sps:$4 sm:$0xff]   ;;  %v1102_v9 = vld [vmem:[#allocation5 + $0x64] ss:$12 sps:$4 sm:$0xff]   ;;  %v1115_v13 = vld [vmem:[#allocation5 + $0x20] ss:$12 sps:$4 sm:$0xff]  }
  0x2a   :  { %v1114_v10 = vld [vmem:[#allocation5 + $0x8] ss:$12 sps:$4 sm:$0xff]   ;;  %v143_v11 = vld [vmem:[#allocation3] sm:$0xff]  ;;  %v1117_v19 = vld [vmem:[#allocation5 + $0x50] ss:$12 sps:$4 sm:$0xff]   ;;  %v687_v50 = vshrl.u32 %v686_v49, 7 }
  0x2b   :  { %1051 = vmatprep.subr.bf16.mxu1 %v1114_v10  ;;  %v1104_v14 = vld [vmem:[#allocation5 + $0x60] ss:$12 sps:$4 sm:$0xff]   ;;  %v159_v15 = vpack.c.bf16 %v144_v12, %v143_v11  ;;  %v1116_v16 = vld [vmem:[#allocation5 + $0x38] ss:$12 sps:$4 sm:$0xff]   ;;  %v1105_v17 = vld [vmem:[#allocation5 + $0x7c] ss:$12 sps:$4 sm:$0xff]  }
  0x2c   :  { %330 = vmatpush1.bf16.msra.mxu0 %v1095_v4  ;;  %1052 = vmatpush3.bf16.msra.mxu1 %v1114_v10  ;;  %v1107_v18 = vld [vmem:[#allocation5 + $0x78] ss:$12 sps:$4 sm:$0xff]   ;;  %v1108_v20 = vld [vmem:[#allocation5 + $0x94] ss:$12 sps:$4 sm:$0xff]   ;;  %v1110_v21 = vld [vmem:[#allocation5 + $0x90] ss:$12 sps:$4 sm:$0xff]  }
  0x2d   :  { %331 = vmatprep.subr.bf16.mxu0 %v1096_v5  ;;  %1053 = vmatprep.subr.bf16.mxu1 %v1115_v13  ;;  %v1118_v22 = vld [vmem:[#allocation5 + $0x68] ss:$12 sps:$4 sm:$0xff]   ;;  %v1111_v23 = vld [vmem:[#allocation5 + $0xac] ss:$12 sps:$4 sm:$0xff]   ;;  %v1121_v29 = vld [vmem:[#allocation5 + $0xb0] ss:$12 sps:$4 sm:$0xff]  }
  0x2e   :  { %1067 = vmatprep.mubr.bf16.mxu1 %v159_v15  ;;  %v1113_v24 = vld [vmem:[#allocation5 + $0xa8] ss:$12 sps:$4 sm:$0xff]   ;;  %v1119_v25 = vld [vmem:[#allocation5 + $0x80] ss:$12 sps:$4 sm:$0xff]   ;;  %v1120_v26 = vld [vmem:[#allocation5 + $0x98] ss:$12 sps:$4 sm:$0xff]  }
  0x2f   :  { %v145_v27 = vld [vmem:[#allocation3 + $0x10] sm:$0xff]  ;;  %v146_v28 = vld [vmem:[#allocation3 + $0x18] sm:$0xff]  ;;  %v147_v31 = vld [vmem:[#allocation3 + $0x20] sm:$0xff]  ;;  %v688_v51 = vsub.s32 0, %v687_v50  ;;  %v692_v53 = vsub.s32 1, %v687_v50  ;;  %v696_v1 = vsub.s32 2, %v687_v50 }
  0x30   :  { %332 = vmatpush1.bf16.msra.mxu0 %v1098_v6  ;;  %1054 = vmatpush3.bf16.msra.mxu1 %v1115_v13  ;;  %v160_v30 = vpack.c.bf16 %v146_v28, %v145_v27  ;;  %v148_v32 = vld [vmem:[#allocation3 + $0x28] sm:$0xff]  ;;  %v149_v34 = vld [vmem:[#allocation3 + $0x30] sm:$0xff]  ;;  %v150_v35 = vld [vmem:[#allocation3 + $0x38] sm:$0xff] }
  0x31   :  { %333 = vmatprep.subr.bf16.mxu0 %v1099_v7  ;;  %1055 = vmatprep.subr.bf16.mxu1 %v1116_v16  ;;  %v161_v33 = vpack.c.bf16 %v148_v32, %v147_v31  ;;  %v151_v36 = vld [vmem:[#allocation3 + $0x40] sm:$0xff]  ;;  %v152_v37 = vld [vmem:[#allocation3 + $0x48] sm:$0xff]  ;;  %v162_v38 = vpack.c.bf16 %v150_v35, %v149_v34  ;;  %v153_v40 = vld [vmem:[#allocation3 + $0x50] sm:$0xff] }
  0x32   :  { %v163_v39 = vpack.c.bf16 %v152_v37, %v151_v36  ;;  %v154_v41 = vld [vmem:[#allocation3 + $0x58] sm:$0xff]  ;;  %v155_v42 = vld [vmem:[#allocation3 + $0x60] sm:$0xff]  ;;  %v156_v43 = vld [vmem:[#allocation3 + $0x68] sm:$0xff] }
  0x33   :  { %v164_v44 = vpack.c.bf16 %v154_v41, %v153_v40  ;;  %v165_v45 = vpack.c.bf16 %v156_v43, %v155_v42  ;;  %v157_v46 = vld [vmem:[#allocation3 + $0x70] sm:$0xff]  ;;  %v158_v47 = vld [vmem:[#allocation3 + $0x78] sm:$0xff]  ;;  %v684_v52 = vld [vmem:[%s1384_s2] sm:$0x7] }
  0x34   :  { %334 = vmatpush1.bf16.msra.mxu0 %v1101_v8  ;;  %1056 = vmatpush3.bf16.msra.mxu1 %v1116_v16  ;;  %v166_v48 = vpack.c.bf16 %v158_v47, %v157_v46  ;;  %v1232_v54 = vrot.slane %v684_v52, %v688_v51  ;;  %v1234_v55 = vrot.slane %v684_v52, %v692_v53 }
  0x35   :  { %335 = vmatprep.subr.bf16.mxu0 %v1102_v9  ;;  %1057 = vmatprep.subr.bf16.mxu1 %v1117_v19  ;;  %v1246_v4 = vrot.slane %v684_v52, %v696_v1 }
  0x38   :  { %336 = vmatpush1.bf16.msra.mxu0 %v1104_v14  ;;  %1058 = vmatpush3.bf16.msra.mxu1 %v1117_v19 }
  0x39   :  { %337 = vmatprep.subr.bf16.mxu0 %v1105_v17  ;;  %1059 = vmatprep.subr.bf16.mxu1 %v1118_v22 }
  0x3c   :  { %338 = vmatpush1.bf16.msra.mxu0 %v1107_v18  ;;  %1060 = vmatpush3.bf16.msra.mxu1 %v1118_v22 }
  0x3d   :  { %339 = vmatprep.subr.bf16.mxu0 %v1108_v20  ;;  %1061 = vmatprep.subr.bf16.mxu1 %v1119_v25 }
  0x40   :  { %340 = vmatpush1.bf16.msra.mxu0 %v1110_v21  ;;  %1062 = vmatpush3.bf16.msra.mxu1 %v1119_v25 }
  0x41   :  { %341 = vmatprep.subr.bf16.mxu0 %v1111_v23  ;;  %1063 = vmatprep.subr.bf16.mxu1 %v1120_v26 }
  0x44   :  { %342 = vmatpush1.bf16.msra.mxu0 %v1113_v24  ;;  %1064 = vmatpush3.bf16.msra.mxu1 %v1120_v26 }
  0x45   :  { %1065 = vmatprep.subr.bf16.mxu1 %v1121_v29 }
  0x47   :  { %360 = vmatmul.mubr.bf16.vlgmr.msra.gmra.mrb[0].mxu0 %v159_v15 }
  0x48   :  { %369 = vmatprep.mubr.bf16.mxu0 %v1176_v0  ;;  %1066 = vmatpush3.bf16.msra.mxu1 %v1121_v29 }
  0x4b   :  { %1068 = vmatmul.mubr.bf16.vlgmr.msra.gmra.mrb[0].mxu1 %v160_v30 }
  0x4c   :  { %1071 = vmatprep.mubr.bf16.mxu1 %v161_v33 }
  0x4f   :  { %370 = vmatmul.mubr.bf16.gmra.mrb[4].mxu0 %v160_v30 }
  0x50   :  { %379 = vmatprep.mubr.bf16.mxu0 %v1176_v0 }
  0x53   :  { %1072 = vmatmul.mubr.bf16.gmra.mrb[4].mxu1 %v162_v38 }
  0x54   :  { %1075 = vmatprep.mubr.bf16.mxu1 %v163_v39 }
  0x57   :  { %380 = vmatmul.mubr.bf16.gmra.mrb[8].mxu0 %v161_v33 }
  0x58   :  { %389 = vmatprep.mubr.bf16.mxu0 %v1176_v0 }
  0x5b   :  { %1076 = vmatmul.mubr.bf16.gmra.mrb[8].mxu1 %v164_v44 }
  0x5c   :  { %1079 = vmatprep.mubr.bf16.mxu1 %v165_v45 }
  0x5f   :  { %390 = vmatmul.mubr.bf16.gmra.mrb[12].mxu0 %v162_v38 }
  0x60   :  { %399 = vmatprep.mubr.bf16.mxu0 %v1176_v0 }
  0x63   :  { %1080 = vmatmul.mubr.bf16.gmra.mrb[12].mxu1 %v166_v48 }
  0x67   :  { %400 = vmatmul.mubr.bf16.gmra.mrb[16].mxu0 %v163_v39 }
  0x68   :  { %409 = vmatprep.mubr.bf16.mxu0 %v1176_v0 }
  0x6f   :  { %410 = vmatmul.mubr.bf16.gmra.mrb[20].mxu0 %v164_v44 }
  0x70   :  { %419 = vmatprep.mubr.bf16.mxu0 %v1176_v0 }
  0x77   :  { %420 = vmatmul.mubr.bf16.gmra.mrb[24].mxu0 %v165_v45 }
  0x78   :  { %429 = vmatprep.mubr.bf16.mxu0 %v1176_v0 }
  0x7f   :  { %430 = vmatmul.mubr.bf16.gmra.mrb[28].mxu0 %v166_v48 }
 0x11a   :  { %v361_v56 = vpop.f32.mrb[0].mxu0 }
 0x11b   :  { %v701_v57 = vadd.f32 %v1232_v54, %v361_v56  ;;  %v363_v58 = vpop.f32.mrb[1].mxu0 }
 0x11c   :  { %v702_v59 = vadd.f32 %v1234_v55, %v363_v58  ;;  %v365_v60 = vpop.f32.mrb[2].mxu0 }
 0x11d   :  { %v704_v61 = vadd.f32 %v1232_v54, %v365_v60  ;;  %v367_v62 = vpop.f32.mrb[3].mxu0 }
 0x11e   :  { %v1003_v63 = vpack.c.bf16 %v702_v59, %v701_v57  ;;  %v705_v0 = vadd.f32 %v1234_v55, %v367_v62  ;;  %v1069_v11 = vpop.f32.mrb[0].mxu1 }
 0x11f   :  { %v709_v14 = vadd.f32 %v1069_v11, %v1246_v4  ;;  %v474_v15 = vpop.f32.mrb[1].mxu1 }
 0x120   :  { %909 = vst [vmem:[%s1385_s3] sm:$0xff] %v1003_v63  ;;  %v1005_v2 = vpack.c.bf16 %v705_v0, %v704_v61  ;;  %v703_v16 = vadd.f32 %v1246_v4, %v474_v15  ;;  %v1070_v17 = vpop.f32.mrb[2].mxu1 }
 0x121   :  { %v1008_v19 = vpack.c.bf16 %v709_v14, %v709_v14  ;;  %v712_v20 = vadd.f32 %v1070_v17, %v1246_v4  ;;  %v477_v21 = vpop.f32.mrb[3].mxu1 }
 0x122   :  { %911 = vst [vmem:[%s1385_s3 + $0xc] sm:$0xff] %v1005_v2  ;;  %v371_v3 = vpop.f32.mrb[4].mxu0  ;;  %v1004_v22 = vpack.c.bf16 %v703_v16, %v703_v16  ;;  %v706_v23 = vadd.f32 %v1246_v4, %v477_v21 }
 0x123   :  { %v707_v5 = vadd.f32 %v1232_v54, %v371_v3  ;;  %v373_v6 = vpop.f32.mrb[5].mxu0  ;;  %914 = vst [vmem:[%s1385_s3 + $0x20] sm:$0xf] %v1008_v19  ;;  %v1010_v25 = vpack.c.bf16 %v712_v20, %v712_v20 }
 0x124   :  { %v708_v7 = vadd.f32 %v1234_v55, %v373_v6  ;;  %v375_v8 = vpop.f32.mrb[6].mxu0  ;;  %910 = vst [vmem:[%s1385_s3 + $0x8] sm:$0xf] %v1004_v22  ;;  %v1006_v28 = vpack.c.bf16 %v706_v23, %v706_v23 }
 0x125   :  { %v710_v9 = vadd.f32 %v1232_v54, %v375_v8  ;;  %v377_v10 = vpop.f32.mrb[7].mxu0  ;;  %916 = vst [vmem:[%s1385_s3 + $0x2c] sm:$0xf] %v1010_v25 }
 0x126   :  { %v1007_v12 = vpack.c.bf16 %v708_v7, %v707_v5  ;;  %v711_v13 = vadd.f32 %v1234_v55, %v377_v10  ;;  %912 = vst [vmem:[%s1385_s3 + $0x14] sm:$0xf] %v1006_v28  ;;  %v1073_v33 = vpop.f32.mrb[4].mxu1 }
 0x127   :  { %v721_v36 = vadd.f32 %v1073_v33, %v1246_v4  ;;  %v490_v37 = vpop.f32.mrb[5].mxu1 }
 0x128   :  { %913 = vst [vmem:[%s1385_s3 + $0x18] sm:$0xff] %v1007_v12  ;;  %v1009_v18 = vpack.c.bf16 %v711_v13, %v710_v9  ;;  %v715_v38 = vadd.f32 %v1246_v4, %v490_v37  ;;  %v1074_v39 = vpop.f32.mrb[6].mxu1 }
 0x129   :  { %v1016_v41 = vpack.c.bf16 %v721_v36, %v721_v36  ;;  %v724_v42 = vadd.f32 %v1074_v39, %v1246_v4  ;;  %v493_v43 = vpop.f32.mrb[7].mxu1 }
 0x12a   :  { %915 = vst [vmem:[%s1385_s3 + $0x24] sm:$0xff] %v1009_v18  ;;  %v381_v24 = vpop.f32.mrb[8].mxu0  ;;  %v1012_v44 = vpack.c.bf16 %v715_v38, %v715_v38  ;;  %v718_v45 = vadd.f32 %v1246_v4, %v493_v43 }
 0x12b   :  { %v713_v26 = vadd.f32 %v1232_v54, %v381_v24  ;;  %v383_v27 = vpop.f32.mrb[9].mxu0  ;;  %922 = vst [vmem:[%s1385_s3 + $0x50] sm:$0xf] %v1016_v41  ;;  %v1018_v47 = vpack.c.bf16 %v724_v42, %v724_v42 }
 0x12c   :  { %v714_v29 = vadd.f32 %v1234_v55, %v383_v27  ;;  %v385_v30 = vpop.f32.mrb[10].mxu0  ;;  %918 = vst [vmem:[%s1385_s3 + $0x38] sm:$0xf] %v1012_v44  ;;  %v1014_v50 = vpack.c.bf16 %v718_v45, %v718_v45 }
 0x12d   :  { %v716_v31 = vadd.f32 %v1232_v54, %v385_v30  ;;  %v387_v32 = vpop.f32.mrb[11].mxu0  ;;  %924 = vst [vmem:[%s1385_s3 + $0x5c] sm:$0xf] %v1018_v47 }
 0x12e   :  { %v1011_v34 = vpack.c.bf16 %v714_v29, %v713_v26  ;;  %v717_v35 = vadd.f32 %v1234_v55, %v387_v32  ;;  %920 = vst [vmem:[%s1385_s3 + $0x44] sm:$0xf] %v1014_v50  ;;  %v1077_v57 = vpop.f32.mrb[8].mxu1 }
 0x12f   :  { %v733_v60 = vadd.f32 %v1077_v57, %v1246_v4  ;;  %v506_v61 = vpop.f32.mrb[9].mxu1 }
 0x130   :  { %917 = vst [vmem:[%s1385_s3 + $0x30] sm:$0xff] %v1011_v34  ;;  %v1013_v40 = vpack.c.bf16 %v717_v35, %v716_v31  ;;  %v727_v62 = vadd.f32 %v1246_v4, %v506_v61  ;;  %v1078_v63 = vpop.f32.mrb[10].mxu1 }
 0x131   :  { %v1024_v1 = vpack.c.bf16 %v733_v60, %v733_v60  ;;  %v736_v2 = vadd.f32 %v1078_v63, %v1246_v4  ;;  %v509_v3 = vpop.f32.mrb[11].mxu1 }
 0x132   :  { %919 = vst [vmem:[%s1385_s3 + $0x3c] sm:$0xff] %v1013_v40  ;;  %v391_v46 = vpop.f32.mrb[12].mxu0  ;;  %v1020_v5 = vpack.c.bf16 %v727_v62, %v727_v62  ;;  %v730_v6 = vadd.f32 %v1246_v4, %v509_v3 }
 0x133   :  { %v719_v48 = vadd.f32 %v1232_v54, %v391_v46  ;;  %v393_v49 = vpop.f32.mrb[13].mxu0  ;;  %930 = vst [vmem:[%s1385_s3 + $0x80] sm:$0xf] %v1024_v1  ;;  %v1026_v8 = vpack.c.bf16 %v736_v2, %v736_v2 }
 0x134   :  { %v720_v51 = vadd.f32 %v1234_v55, %v393_v49  ;;  %v395_v52 = vpop.f32.mrb[14].mxu0  ;;  %926 = vst [vmem:[%s1385_s3 + $0x68] sm:$0xf] %v1020_v5  ;;  %v1022_v11 = vpack.c.bf16 %v730_v6, %v730_v6 }
 0x135   :  { %v722_v53 = vadd.f32 %v1232_v54, %v395_v52  ;;  %v397_v56 = vpop.f32.mrb[15].mxu0  ;;  %932 = vst [vmem:[%s1385_s3 + $0x8c] sm:$0xf] %v1026_v8 }
 0x136   :  { %v1015_v58 = vpack.c.bf16 %v720_v51, %v719_v48  ;;  %v723_v59 = vadd.f32 %v1234_v55, %v397_v56  ;;  %928 = vst [vmem:[%s1385_s3 + $0x74] sm:$0xf] %v1022_v11  ;;  %v1081_v16 = vpop.f32.mrb[12].mxu1 }
 0x137   :  { %v745_v19 = vadd.f32 %v1081_v16, %v1246_v4  ;;  %v522_v20 = vpop.f32.mrb[13].mxu1 }
 0x138   :  { %921 = vst [vmem:[%s1385_s3 + $0x48] sm:$0xff] %v1015_v58  ;;  %v1017_v0 = vpack.c.bf16 %v723_v59, %v722_v53  ;;  %v739_v21 = vadd.f32 %v1246_v4, %v522_v20  ;;  %v1082_v22 = vpop.f32.mrb[14].mxu1 }
 0x139   :  { %v1032_v24 = vpack.c.bf16 %v745_v19, %v745_v19  ;;  %v748_v25 = vadd.f32 %v1082_v22, %v1246_v4  ;;  %v525_v26 = vpop.f32.mrb[15].mxu1 }
 0x13a   :  { %923 = vst [vmem:[%s1385_s3 + $0x54] sm:$0xff] %v1017_v0  ;;  %v401_v7 = vpop.f32.mrb[16].mxu0  ;;  %v1028_v27 = vpack.c.bf16 %v739_v21, %v739_v21  ;;  %v742_v28 = vadd.f32 %v1246_v4, %v525_v26 }
 0x13b   :  { %v725_v9 = vadd.f32 %v1232_v54, %v401_v7  ;;  %v403_v10 = vpop.f32.mrb[17].mxu0  ;;  %938 = vst [vmem:[%s1385_s3 + $0xb0] sm:$0xf] %v1032_v24  ;;  %v1034_v30 = vpack.c.bf16 %v748_v25, %v748_v25 }
 0x13c   :  { %v726_v12 = vadd.f32 %v1234_v55, %v403_v10  ;;  %v405_v13 = vpop.f32.mrb[18].mxu0  ;;  %934 = vst [vmem:[%s1385_s3 + $0x98] sm:$0xf] %v1028_v27  ;;  %v1030_v33 = vpack.c.bf16 %v742_v28, %v742_v28 }
 0x13d   :  { %v728_v14 = vadd.f32 %v1232_v54, %v405_v13  ;;  %v407_v15 = vpop.f32.mrb[19].mxu0  ;;  %940 = vst [vmem:[%s1385_s3 + $0xbc] sm:$0xf] %v1034_v30 }
 0x13e   :  { %v1019_v17 = vpack.c.bf16 %v726_v12, %v725_v9  ;;  %v729_v18 = vadd.f32 %v1234_v55, %v407_v15  ;;  %936 = vst [vmem:[%s1385_s3 + $0xa4] sm:$0xf] %v1030_v33 }
 0x140   :  { %925 = vst [vmem:[%s1385_s3 + $0x60] sm:$0xff] %v1019_v17  ;;  %v1021_v23 = vpack.c.bf16 %v729_v18, %v728_v14 }
 0x142   :  { %927 = vst [vmem:[%s1385_s3 + $0x6c] sm:$0xff] %v1021_v23  ;;  %v411_v29 = vpop.f32.mrb[20].mxu0 }
 0x143   :  { %v731_v31 = vadd.f32 %v1232_v54, %v411_v29  ;;  %v413_v32 = vpop.f32.mrb[21].mxu0 }
 0x144   :  { %v732_v4 = vadd.f32 %v1234_v55, %v413_v32  ;;  %v415_v34 = vpop.f32.mrb[22].mxu0 }
 0x145   :  { %v734_v35 = vadd.f32 %v1232_v54, %v415_v34  ;;  %v417_v36 = vpop.f32.mrb[23].mxu0 }
 0x146   :  { %v1023_v37 = vpack.c.bf16 %v732_v4, %v731_v31  ;;  %v735_v38 = vadd.f32 %v1234_v55, %v417_v36 }
 0x148   :  { %929 = vst [vmem:[%s1385_s3 + $0x78] sm:$0xff] %v1023_v37  ;;  %v1025_v39 = vpack.c.bf16 %v735_v38, %v734_v35 }
 0x14a   :  { %931 = vst [vmem:[%s1385_s3 + $0x84] sm:$0xff] %v1025_v39  ;;  %v421_v40 = vpop.f32.mrb[24].mxu0 }
 0x14b   :  { %v737_v41 = vadd.f32 %v1232_v54, %v421_v40  ;;  %v423_v42 = vpop.f32.mrb[25].mxu0 }
 0x14c   :  { %v738_v43 = vadd.f32 %v1234_v55, %v423_v42  ;;  %v425_v44 = vpop.f32.mrb[26].mxu0 }
 0x14d   :  { %v740_v45 = vadd.f32 %v1232_v54, %v425_v44  ;;  %v427_v46 = vpop.f32.mrb[27].mxu0 }
 0x14e   :  { %v1027_v47 = vpack.c.bf16 %v738_v43, %v737_v41  ;;  %v741_v48 = vadd.f32 %v1234_v55, %v427_v46 }
 0x150   :  { %933 = vst [vmem:[%s1385_s3 + $0x90] sm:$0xff] %v1027_v47  ;;  %v1029_v49 = vpack.c.bf16 %v741_v48, %v740_v45 }
 0x152   :  { %935 = vst [vmem:[%s1385_s3 + $0x9c] sm:$0xff] %v1029_v49  ;;  %v431_v50 = vpop.f32.mrb[28].mxu0 }
 0x153   :  { %v743_v51 = vadd.f32 %v1232_v54, %v431_v50  ;;  %v433_v52 = vpop.f32.mrb[29].mxu0 }
 0x154   :  { %v744_v53 = vadd.f32 %v1234_v55, %v433_v52  ;;  %v435_v56 = vpop.f32.mrb[30].mxu0 }
 0x155   :  { %v746_v57 = vadd.f32 %v1232_v54, %v435_v56  ;;  %v437_v58 = vpop.f32.mrb[31].mxu0 }
 0x156   :  { %v1031_v59 = vpack.c.bf16 %v744_v53, %v743_v51  ;;  %v747_v60 = vadd.f32 %v1234_v55, %v437_v58 }
 0x158   :  { %937 = vst [vmem:[%s1385_s3 + $0xa8] sm:$0xff] %v1031_v59  ;;  %v1033_v61 = vpack.c.bf16 %v747_v60, %v746_v57 }
 0x15a   :  { %939 = vst [vmem:[%s1385_s3 + $0xb4] sm:$0xff] %v1033_v61 }
 0x15b   :  { %945 = vsyncpa [#allocation4], 1 }
 0x15c   :  { %946 = vsyncpa [#allocation6], 1 }

</bundles_post_ra>
